<compile_context>
chip_gen: v6e
topology: v6e:2x2x1
jax: 0.10.0
libtpu: 0.0.40
codegen_flags: <defaults>
</compile_context>

<pallas_src>
import functools

import jax
import jax.numpy as jnp
from jax.experimental import pallas as pl
from jax.experimental.pallas import tpu as pltpu

MID_C = 64          # mid_c in the PyTorch module
EPS = 1e-5          # nn.InstanceNorm2d default eps
LRELU_SLOPE = 0.2   # nn.LeakyReLU(0.2)


def _spade_kernel(x_ref, p1_ref, w1t_ref, b1_ref, wgb_ref, bgb_ref, o_ref,
                  act_ext, *, W, off0):
    """One batch element per grid step; all arrays are (C, H*W) lane-dense.

    x_ref   : (1, Cx, HW)        input to normalize (NCHW flattened over H*W)
    p1_ref  : (1, 9*Cref, HW)    im2col slab of `ref` (tap-major, built by XLA)
    w1t_ref : (MID_C, 9*Cref)    conv1 weight, transposed for a (Cout, K) LHS
    b1_ref  : (MID_C, 1)
    wgb_ref : (9, 2*Cx, MID_C)   per-tap gamma|beta weights fused along rows
    bgb_ref : (2*Cx, 1)
    o_ref   : (1, Cx, HW)        output (NCHW flattened over H*W)
    act_ext : (MID_C, EXT)       zero-haloed activation buffer (VMEM scratch)
    """
    Cx = x_ref.shape[1]
    HW = x_ref.shape[2]

    # ---- param-free InstanceNorm2d: dense lane reductions over H*W ---------
    x = x_ref[0].astype(jnp.float32)                       # (Cx, HW)
    mean = jnp.mean(x, axis=1, keepdims=True)
    xc = x - mean
    var = jnp.mean(xc * xc, axis=1, keepdims=True)
    xn = xc * jax.lax.rsqrt(var + EPS)

    # ---- conv1 (3x3 same) as one transposed im2col matmul + LeakyReLU ------
    act = jnp.dot(w1t_ref[...], p1_ref[0],
                  preferred_element_type=jnp.float32)      # (MID_C, HW)
    act = act + b1_ref[...]
    act = jnp.where(act >= 0, act, LRELU_SLOPE * act)

    # ---- gamma/beta conv: 9 accumulated matmuls over lane-shifted views ----
    # act_ext holds `act` at lane offset `off0` with zero halos on both sides,
    # so taps that fall off the top/bottom image rows read zeros; only the
    # left/right column wrap within a row needs explicit masking.
    act_ext[...] = jnp.zeros_like(act_ext)         # cheap aligned full memset
    act_ext[:, off0:off0 + HW] = act               # lane-aligned interior

    col = jax.lax.broadcasted_iota(jnp.int32, (1, HW), 1) % W
    not_left = col != 0            # valid lanes for the dw = -1 taps
    not_right = col != W - 1       # valid lanes for the dw = +1 taps

    gb = jnp.zeros((2 * Cx, HW), jnp.float32)
    for k in range(9):                              # static, unrolled
        dh, dw = k // 3 - 1, k % 3 - 1
        start = off0 + dh * W + dw
        tap = act_ext[:, start:start + HW]          # (MID_C, HW)
        if dw == -1:
            tap = jnp.where(not_left, tap, 0.0)
        elif dw == 1:
            tap = jnp.where(not_right, tap, 0.0)
        gb = gb + jnp.dot(wgb_ref[k], tap,
                          preferred_element_type=jnp.float32)
    gb = gb + bgb_ref[...]                          # (2*Cx, HW)

    # ---- SPADE modulation (lane-dense store) -------------------------------
    gamma = gb[:Cx, :]
    beta = gb[Cx:, :]
    o_ref[0] = (xn * gamma + beta).astype(o_ref.dtype)


def spade_norm(x_nchw, ref_nchw, params):
    """SPADENorm forward (norm_type='spade'). Inputs/outputs are NCHW."""
    w1, b1, wg, bg, wb, bb = params
    assert x_nchw.shape[2:] == ref_nchw.shape[2:]

    N, Cx, H, W = x_nchw.shape
    Cref = ref_nchw.shape[1]
    HW = H * W

    x_flat = x_nchw.reshape(N, Cx, HW).astype(jnp.float32)   # pure reshape

    # im2col slab of `ref`, tap-major, spatial-on-lanes: (N, 9*Cref, HW).
    ref_pad = jnp.pad(ref_nchw.astype(jnp.float32),
                      ((0, 0), (0, 0), (1, 1), (1, 1)))
    taps = [ref_pad[:, :, dh:dh + H, dw:dw + W]
            for dh in range(3) for dw in range(3)]
    p1 = jnp.concatenate(taps, axis=1).reshape(N, 9 * Cref, HW)

    # Conv weights reshaped for the (Cout, K) x (K, HW) matmuls (HWIO input).
    w1t = w1.reshape(9 * Cref, MID_C).T                       # (MID_C, 9*Cref)
    b1_2d = b1.reshape(MID_C, 1)
    wg_t = jnp.transpose(wg.reshape(9, MID_C, Cx), (0, 2, 1))  # (9, Cx, MID_C)
    wb_t = jnp.transpose(wb.reshape(9, MID_C, Cx), (0, 2, 1))
    wgb = jnp.concatenate([wg_t, wb_t], axis=1)               # (9, 2Cx, MID_C)
    bgb = jnp.concatenate([bg, bb], axis=0).reshape(2 * Cx, 1)

    # Activation halo buffer: lane-aligned interior at off0, zero halos of at
    # least W+1 lanes on each side, total rounded up to a multiple of 128.
    off0 = ((W + 1 + 127) // 128) * 128
    ext = ((off0 + HW + W + 1 + 127) // 128) * 128

    kernel = functools.partial(_spade_kernel, W=W, off0=off0)
    full = lambda shape: pl.BlockSpec(shape, lambda n: (0,) * len(shape))

    out_flat = pl.pallas_call(
        kernel,
        out_shape=jax.ShapeDtypeStruct((N, Cx, HW), jnp.float32),
        grid_spec=pltpu.PrefetchScalarGridSpec(
            num_scalar_prefetch=0,
            grid=(N,),
            in_specs=[
                pl.BlockSpec((1, Cx, HW), lambda n: (n, 0, 0)),
                pl.BlockSpec((1, 9 * Cref, HW), lambda n: (n, 0, 0)),
                full((MID_C, 9 * Cref)),
                full((MID_C, 1)),
                full((9, 2 * Cx, MID_C)),
                full((2 * Cx, 1)),
            ],
            out_specs=pl.BlockSpec((1, Cx, HW), lambda n: (n, 0, 0)),
            scratch_shapes=[pltpu.VMEM((MID_C, ext), jnp.float32)],
        ),
        compiler_params=pltpu.CompilerParams(
            dimension_semantics=("parallel",),
        ),
    )(x_flat, p1, w1t, b1_2d, wgb, bgb)

    return out_flat.reshape(N, Cx, H, W)                      # free reshape


def make_params(key, norm_nc, ref_nc):
    """Deterministic synthetic parameters (HWIO conv weights)."""
    ks = jax.random.split(key, 6)
    w1 = 0.1 * jax.random.normal(ks[0], (3, 3, ref_nc, MID_C), jnp.float32)
    b1 = 0.1 * jax.random.normal(ks[1], (MID_C,), jnp.float32)
    wg = 0.1 * jax.random.normal(ks[2], (3, 3, MID_C, norm_nc), jnp.float32)
    bg = 0.1 * jax.random.normal(ks[3], (norm_nc,), jnp.float32)
    wb = 0.1 * jax.random.normal(ks[4], (3, 3, MID_C, norm_nc), jnp.float32)
    bb = 0.1 * jax.random.normal(ks[5], (norm_nc,), jnp.float32)
    return (w1, b1, wg, bg, wb, bb)


def _reference(x, ref, params):
    """Pure-JAX reference mirroring the PyTorch forward (NCHW)."""
    w1, b1, wg, bg, wb, bb = params
    mean = jnp.mean(x, axis=(2, 3), keepdims=True)
    var = jnp.mean((x - mean) ** 2, axis=(2, 3), keepdims=True)
    xn = (x - mean) / jnp.sqrt(var + EPS)

    def conv(inp, w, b):
        out = jax.lax.conv_general_dilated(
            inp, w, window_strides=(1, 1), padding="SAME",
            dimension_numbers=("NCHW", "HWIO", "NCHW"))
        return out + b[None, :, None, None]

    act = conv(ref, w1, b1)
    act = jnp.where(act >= 0, act, LRELU_SLOPE * act)
    gamma = conv(act, wg, bg)
    beta = conv(act, wb, bb)
    return xn * gamma + beta


if __name__ == "__main__":
    N, NORM_NC, REF_NC, H, W = 2, 4, 3, 16, 16

    key = jax.random.PRNGKey(0)
    kx, kr, kp = jax.random.split(key, 3)
    x = jax.random.normal(kx, (N, NORM_NC, H, W), jnp.float32)
    ref = jax.random.normal(kr, (N, REF_NC, H, W), jnp.float32)
    params = make_params(kp, NORM_NC, REF_NC)

    out = jax.block_until_ready(jax.jit(spade_norm)(x, ref, params))
    want = jax.block_until_ready(_reference(x, ref, params))

    assert out.shape == (N, NORM_NC, H, W)
    err = float(jnp.max(jnp.abs(out - want)))
    assert jnp.allclose(out, want, rtol=1e-4, atol=1e-4), err
    print("KERNEL_OK")
</pallas_src>

<mosaic_0001>
module attributes {stable_mosaic.version = 11 : i64} {
  func.func @_spade_kernel(%arg0: i32, %arg1: memref<1x4x256xf32, #tpu.memory_space<vmem>>, %arg2: memref<1x27x256xf32, #tpu.memory_space<vmem>>, %arg3: memref<64x27xf32, #tpu.memory_space<vmem>>, %arg4: memref<64x1xf32, #tpu.memory_space<vmem>>, %arg5: memref<9x8x64xf32, #tpu.memory_space<vmem>>, %arg6: memref<8x1xf32, #tpu.memory_space<vmem>>, %arg7: memref<1x4x256xf32, #tpu.memory_space<vmem>>, %arg8: memref<64x512xf32, #tpu.memory_space<vmem>>) attributes {dimension_semantics = [#tpu.dimension_semantics<parallel>], iteration_bounds = array<i64: 2>, scalar_prefetch = 0 : i64, scratch_operands = 1 : i64, tpu.core_type = #tpu.core_type<tc>, window_params = [{transform_indices = @transform_0, window_bounds = array<i64: 1, 4, 256>}, {transform_indices = @transform_1, window_bounds = array<i64: 1, 27, 256>}, {pipeline_mode = #tpu.pipeline_mode<synchronous>, transform_indices = @transform_2, window_bounds = array<i64: 64, 27>}, {pipeline_mode = #tpu.pipeline_mode<synchronous>, transform_indices = @transform_3, window_bounds = array<i64: 64, 1>}, {pipeline_mode = #tpu.pipeline_mode<synchronous>, transform_indices = @transform_4, window_bounds = array<i64: 9, 8, 64>}, {pipeline_mode = #tpu.pipeline_mode<synchronous>, transform_indices = @transform_5, window_bounds = array<i64: 8, 1>}, {transform_indices = @transform_6, window_bounds = array<i64: 1, 4, 256>}]} {
    %c0 = arith.constant 0 : index
    %c0_0 = arith.constant 0 : index
    %c0_1 = arith.constant 0 : index
    %0 = vector.load %arg1[%c0, %c0_0, %c0_1] : memref<1x4x256xf32, #tpu.memory_space<vmem>>, vector<1x4x256xf32>
    %1 = vector.shape_cast %0 : vector<1x4x256xf32> to vector<4x256xf32>
    %cst = arith.constant dense<0.000000e+00> : vector<4xf32>
    %2 = vector.multi_reduction <add>, %1, %cst [1] : vector<4x256xf32> to vector<4xf32>
    %3 = vector.shape_cast %2 : vector<4xf32> to vector<4x1xf32>
    %cst_2 = arith.constant 2.560000e+02 : f32
    %4 = vector.broadcast %cst_2 : f32 to vector<4x1xf32>
    %5 = arith.divf %3, %4 : vector<4x1xf32>
    %6 = vector.broadcast %5 : vector<4x1xf32> to vector<4x256xf32>
    %7 = arith.subf %1, %6 : vector<4x256xf32>
    %8 = arith.mulf %7, %7 : vector<4x256xf32>
    %cst_3 = arith.constant dense<0.000000e+00> : vector<4xf32>
    %9 = vector.multi_reduction <add>, %8, %cst_3 [1] : vector<4x256xf32> to vector<4xf32>
    %10 = vector.shape_cast %9 : vector<4xf32> to vector<4x1xf32>
    %cst_4 = arith.constant 2.560000e+02 : f32
    %11 = vector.broadcast %cst_4 : f32 to vector<4x1xf32>
    %12 = arith.divf %10, %11 : vector<4x1xf32>
    %cst_5 = arith.constant 9.99999974E-6 : f32
    %13 = vector.broadcast %cst_5 : f32 to vector<4x1xf32>
    %14 = arith.addf %12, %13 : vector<4x1xf32>
    %15 = math.rsqrt %14 : vector<4x1xf32>
    %16 = vector.broadcast %15 : vector<4x1xf32> to vector<4x256xf32>
    %17 = arith.mulf %7, %16 : vector<4x256xf32>
    %c0_6 = arith.constant 0 : index
    %c0_7 = arith.constant 0 : index
    %18 = vector.load %arg3[%c0_6, %c0_7] : memref<64x27xf32, #tpu.memory_space<vmem>>, vector<64x27xf32>
    %c0_8 = arith.constant 0 : index
    %c0_9 = arith.constant 0 : index
    %c0_10 = arith.constant 0 : index
    %19 = vector.load %arg2[%c0_8, %c0_9, %c0_10] : memref<1x27x256xf32, #tpu.memory_space<vmem>>, vector<1x27x256xf32>
    %20 = vector.shape_cast %19 : vector<1x27x256xf32> to vector<27x256xf32>
    %cst_11 = arith.constant dense<0.000000e+00> : vector<64x256xf32>
    %21 = tpu.matmul %18, %20, %cst_11 {dimension_numbers = #tpu.dot_dimension_numbers<[1], [0], [0], [1], [0, 0, 1, 1], [], []>} : vector<64x27xf32>, vector<27x256xf32>, vector<64x256xf32> -> vector<64x256xf32>
    %c0_12 = arith.constant 0 : index
    %c0_13 = arith.constant 0 : index
    %22 = vector.load %arg4[%c0_12, %c0_13] : memref<64x1xf32, #tpu.memory_space<vmem>>, vector<64x1xf32>
    %23 = vector.broadcast %22 : vector<64x1xf32> to vector<64x256xf32>
    %24 = arith.addf %21, %23 : vector<64x256xf32>
    %cst_14 = arith.constant 0.000000e+00 : f32
    %25 = vector.broadcast %cst_14 : f32 to vector<64x256xf32>
    %26 = arith.cmpf oge, %24, %25 : vector<64x256xf32>
    %cst_15 = arith.constant 2.000000e-01 : f32
    %27 = vector.broadcast %cst_15 : f32 to vector<64x256xf32>
    %28 = arith.mulf %27, %24 : vector<64x256xf32>
    %29 = arith.select %26, %24, %28 : vector<64x256xi1>, vector<64x256xf32>
    %cst_16 = arith.constant 0.000000e+00 : f32
    %30 = vector.broadcast %cst_16 : f32 to vector<64x512xf32>
    %c0_17 = arith.constant 0 : index
    %c0_18 = arith.constant 0 : index
    %31 = vector.load %arg8[%c0_17, %c0_18] : memref<64x512xf32, #tpu.memory_space<vmem>>, vector<64x512xf32>
    tpu.vector_store %arg8[%c0_17, %c0_18], %30 {strides = array<i32>} : memref<64x512xf32, #tpu.memory_space<vmem>>, vector<64x512xf32>,
    %c0_19 = arith.constant 0 : index
    %c128 = arith.constant 128 : index
    %32 = vector.load %arg8[%c0_19, %c128] : memref<64x512xf32, #tpu.memory_space<vmem>>, vector<64x256xf32>
    tpu.vector_store %arg8[%c0_19, %c128], %29 {strides = array<i32>} : memref<64x512xf32, #tpu.memory_space<vmem>>, vector<64x256xf32>,
    %33 = tpu.iota {dimensions = array<i32: 1>} : vector<1x256xi32>
    %c16_i32 = arith.constant 16 : i32
    %c0_i32 = arith.constant 0 : i32
    %34 = arith.cmpi eq, %c16_i32, %c0_i32 : i32
    %c1_i32 = arith.constant 1 : i32
    %35 = arith.select %34, %c1_i32, %c16_i32 : i32
    %36 = vector.broadcast %35 : i32 to vector<1x256xi32>
    %37 = arith.remsi %33, %36 : vector<1x256xi32>
    %c0_i32_20 = arith.constant 0 : i32
    %38 = vector.broadcast %c0_i32_20 : i32 to vector<1x256xi32>
    %39 = arith.cmpi ne, %37, %38 : vector<1x256xi32>
    %c0_i32_21 = arith.constant 0 : i32
    %40 = vector.broadcast %c0_i32_21 : i32 to vector<1x256xi32>
    %41 = arith.cmpi slt, %37, %40 : vector<1x256xi32>
    %c0_i32_22 = arith.constant 0 : i32
    %42 = arith.cmpi slt, %35, %c0_i32_22 : i32
    %43 = vector.broadcast %42 : i1 to vector<1x256xi1>
    %44 = vector.broadcast %43 : vector<1x256xi1> to vector<1x256xi1>
    %45 = arith.xori %41, %44 : vector<1x256xi1>
    %46 = arith.andi %45, %39 : vector<1x256xi1>
    %47 = vector.broadcast %35 : i32 to vector<1x256xi32>
    %48 = arith.addi %37, %47 : vector<1x256xi32>
    %49 = arith.select %46, %48, %37 : vector<1x256xi1>, vector<1x256xi32>
    %c0_i32_23 = arith.constant 0 : i32
    %50 = vector.broadcast %c0_i32_23 : i32 to vector<1x256xi32>
    %51 = arith.cmpi ne, %49, %50 : vector<1x256xi32>
    %c15_i32 = arith.constant 15 : i32
    %52 = vector.broadcast %c15_i32 : i32 to vector<1x256xi32>
    %53 = arith.cmpi ne, %49, %52 : vector<1x256xi32>
    %cst_24 = arith.constant 0.000000e+00 : f32
    %54 = vector.broadcast %cst_24 : f32 to vector<8x256xf32>
    %c0_25 = arith.constant 0 : index
    %c111 = arith.constant 111 : index
    %55 = vector.load %arg8[%c0_25, %c111] : memref<64x512xf32, #tpu.memory_space<vmem>>, vector<64x256xf32>
    %cst_26 = arith.constant 0.000000e+00 : f32
    %56 = vector.shape_cast %51 : vector<1x256xi1> to vector<1x256xi1>
    %57 = vector.broadcast %56 : vector<1x256xi1> to vector<64x256xi1>
    %58 = vector.broadcast %cst_26 : f32 to vector<64x256xf32>
    %59 = arith.select %57, %55, %58 : vector<64x256xi1>, vector<64x256xf32>
    %c0_27 = arith.constant 0 : index
    %c0_28 = arith.constant 0 : index
    %c0_29 = arith.constant 0 : index
    %60 = vector.load %arg5[%c0_27, %c0_28, %c0_29] : memref<9x8x64xf32, #tpu.memory_space<vmem>>, vector<1x8x64xf32>
    %61 = vector.shape_cast %60 : vector<1x8x64xf32> to vector<8x64xf32>
    %cst_30 = arith.constant dense<0.000000e+00> : vector<8x256xf32>
    %62 = tpu.matmul %61, %59, %cst_30 {dimension_numbers = #tpu.dot_dimension_numbers<[1], [0], [0], [1], [0, 0, 1, 1], [], []>} : vector<8x64xf32>, vector<64x256xf32>, vector<8x256xf32> -> vector<8x256xf32>
    %63 = arith.addf %54, %62 : vector<8x256xf32>
    %c0_31 = arith.constant 0 : index
    %c112 = arith.constant 112 : index
    %64 = vector.load %arg8[%c0_31, %c112] : memref<64x512xf32, #tpu.memory_space<vmem>>, vector<64x256xf32>
    %c1 = arith.constant 1 : index
    %c0_32 = arith.constant 0 : index
    %c0_33 = arith.constant 0 : index
    %65 = vector.load %arg5[%c1, %c0_32, %c0_33] : memref<9x8x64xf32, #tpu.memory_space<vmem>>, vector<1x8x64xf32>
    %66 = vector.shape_cast %65 : vector<1x8x64xf32> to vector<8x64xf32>
    %cst_34 = arith.constant dense<0.000000e+00> : vector<8x256xf32>
    %67 = tpu.matmul %66, %64, %cst_34 {dimension_numbers = #tpu.dot_dimension_numbers<[1], [0], [0], [1], [0, 0, 1, 1], [], []>} : vector<8x64xf32>, vector<64x256xf32>, vector<8x256xf32> -> vector<8x256xf32>
    %68 = arith.addf %63, %67 : vector<8x256xf32>
    %c0_35 = arith.constant 0 : index
    %c113 = arith.constant 113 : index
    %69 = vector.load %arg8[%c0_35, %c113] : memref<64x512xf32, #tpu.memory_space<vmem>>, vector<64x256xf32>
    %cst_36 = arith.constant 0.000000e+00 : f32
    %70 = vector.shape_cast %53 : vector<1x256xi1> to vector<1x256xi1>
    %71 = vector.broadcast %70 : vector<1x256xi1> to vector<64x256xi1>
    %72 = vector.broadcast %cst_36 : f32 to vector<64x256xf32>
    %73 = arith.select %71, %69, %72 : vector<64x256xi1>, vector<64x256xf32>
    %c2 = arith.constant 2 : index
    %c0_37 = arith.constant 0 : index
    %c0_38 = arith.constant 0 : index
    %74 = vector.load %arg5[%c2, %c0_37, %c0_38] : memref<9x8x64xf32, #tpu.memory_space<vmem>>, vector<1x8x64xf32>
    %75 = vector.shape_cast %74 : vector<1x8x64xf32> to vector<8x64xf32>
    %cst_39 = arith.constant dense<0.000000e+00> : vector<8x256xf32>
    %76 = tpu.matmul %75, %73, %cst_39 {dimension_numbers = #tpu.dot_dimension_numbers<[1], [0], [0], [1], [0, 0, 1, 1], [], []>} : vector<8x64xf32>, vector<64x256xf32>, vector<8x256xf32> -> vector<8x256xf32>
    %77 = arith.addf %68, %76 : vector<8x256xf32>
    %c0_40 = arith.constant 0 : index
    %c127 = arith.constant 127 : index
    %78 = vector.load %arg8[%c0_40, %c127] : memref<64x512xf32, #tpu.memory_space<vmem>>, vector<64x256xf32>
    %cst_41 = arith.constant 0.000000e+00 : f32
    %79 = vector.shape_cast %51 : vector<1x256xi1> to vector<1x256xi1>
    %80 = vector.broadcast %79 : vector<1x256xi1> to vector<64x256xi1>
    %81 = vector.broadcast %cst_41 : f32 to vector<64x256xf32>
    %82 = arith.select %80, %78, %81 : vector<64x256xi1>, vector<64x256xf32>
    %c3 = arith.constant 3 : index
    %c0_42 = arith.constant 0 : index
    %c0_43 = arith.constant 0 : index
    %83 = vector.load %arg5[%c3, %c0_42, %c0_43] : memref<9x8x64xf32, #tpu.memory_space<vmem>>, vector<1x8x64xf32>
    %84 = vector.shape_cast %83 : vector<1x8x64xf32> to vector<8x64xf32>
    %cst_44 = arith.constant dense<0.000000e+00> : vector<8x256xf32>
    %85 = tpu.matmul %84, %82, %cst_44 {dimension_numbers = #tpu.dot_dimension_numbers<[1], [0], [0], [1], [0, 0, 1, 1], [], []>} : vector<8x64xf32>, vector<64x256xf32>, vector<8x256xf32> -> vector<8x256xf32>
    %86 = arith.addf %77, %85 : vector<8x256xf32>
    %c0_45 = arith.constant 0 : index
    %c128_46 = arith.constant 128 : index
    %87 = vector.load %arg8[%c0_45, %c128_46] : memref<64x512xf32, #tpu.memory_space<vmem>>, vector<64x256xf32>
    %c4 = arith.constant 4 : index
    %c0_47 = arith.constant 0 : index
    %c0_48 = arith.constant 0 : index
    %88 = vector.load %arg5[%c4, %c0_47, %c0_48] : memref<9x8x64xf32, #tpu.memory_space<vmem>>, vector<1x8x64xf32>
    %89 = vector.shape_cast %88 : vector<1x8x64xf32> to vector<8x64xf32>
    %cst_49 = arith.constant dense<0.000000e+00> : vector<8x256xf32>
    %90 = tpu.matmul %89, %87, %cst_49 {dimension_numbers = #tpu.dot_dimension_numbers<[1], [0], [0], [1], [0, 0, 1, 1], [], []>} : vector<8x64xf32>, vector<64x256xf32>, vector<8x256xf32> -> vector<8x256xf32>
    %91 = arith.addf %86, %90 : vector<8x256xf32>
    %c0_50 = arith.constant 0 : index
    %c129 = arith.constant 129 : index
    %92 = vector.load %arg8[%c0_50, %c129] : memref<64x512xf32, #tpu.memory_space<vmem>>, vector<64x256xf32>
    %cst_51 = arith.constant 0.000000e+00 : f32
    %93 = vector.shape_cast %53 : vector<1x256xi1> to vector<1x256xi1>
    %94 = vector.broadcast %93 : vector<1x256xi1> to vector<64x256xi1>
    %95 = vector.broadcast %cst_51 : f32 to vector<64x256xf32>
    %96 = arith.select %94, %92, %95 : vector<64x256xi1>, vector<64x256xf32>
    %c5 = arith.constant 5 : index
    %c0_52 = arith.constant 0 : index
    %c0_53 = arith.constant 0 : index
    %97 = vector.load %arg5[%c5, %c0_52, %c0_53] : memref<9x8x64xf32, #tpu.memory_space<vmem>>, vector<1x8x64xf32>
    %98 = vector.shape_cast %97 : vector<1x8x64xf32> to vector<8x64xf32>
    %cst_54 = arith.constant dense<0.000000e+00> : vector<8x256xf32>
    %99 = tpu.matmul %98, %96, %cst_54 {dimension_numbers = #tpu.dot_dimension_numbers<[1], [0], [0], [1], [0, 0, 1, 1], [], []>} : vector<8x64xf32>, vector<64x256xf32>, vector<8x256xf32> -> vector<8x256xf32>
    %100 = arith.addf %91, %99 : vector<8x256xf32>
    %c0_55 = arith.constant 0 : index
    %c143 = arith.constant 143 : index
    %101 = vector.load %arg8[%c0_55, %c143] : memref<64x512xf32, #tpu.memory_space<vmem>>, vector<64x256xf32>
    %cst_56 = arith.constant 0.000000e+00 : f32
    %102 = vector.shape_cast %51 : vector<1x256xi1> to vector<1x256xi1>
    %103 = vector.broadcast %102 : vector<1x256xi1> to vector<64x256xi1>
    %104 = vector.broadcast %cst_56 : f32 to vector<64x256xf32>
    %105 = arith.select %103, %101, %104 : vector<64x256xi1>, vector<64x256xf32>
    %c6 = arith.constant 6 : index
    %c0_57 = arith.constant 0 : index
    %c0_58 = arith.constant 0 : index
    %106 = vector.load %arg5[%c6, %c0_57, %c0_58] : memref<9x8x64xf32, #tpu.memory_space<vmem>>, vector<1x8x64xf32>
    %107 = vector.shape_cast %106 : vector<1x8x64xf32> to vector<8x64xf32>
    %cst_59 = arith.constant dense<0.000000e+00> : vector<8x256xf32>
    %108 = tpu.matmul %107, %105, %cst_59 {dimension_numbers = #tpu.dot_dimension_numbers<[1], [0], [0], [1], [0, 0, 1, 1], [], []>} : vector<8x64xf32>, vector<64x256xf32>, vector<8x256xf32> -> vector<8x256xf32>
    %109 = arith.addf %100, %108 : vector<8x256xf32>
    %c0_60 = arith.constant 0 : index
    %c144 = arith.constant 144 : index
    %110 = vector.load %arg8[%c0_60, %c144] : memref<64x512xf32, #tpu.memory_space<vmem>>, vector<64x256xf32>
    %c7 = arith.constant 7 : index
    %c0_61 = arith.constant 0 : index
    %c0_62 = arith.constant 0 : index
    %111 = vector.load %arg5[%c7, %c0_61, %c0_62] : memref<9x8x64xf32, #tpu.memory_space<vmem>>, vector<1x8x64xf32>
    %112 = vector.shape_cast %111 : vector<1x8x64xf32> to vector<8x64xf32>
    %cst_63 = arith.constant dense<0.000000e+00> : vector<8x256xf32>
    %113 = tpu.matmul %112, %110, %cst_63 {dimension_numbers = #tpu.dot_dimension_numbers<[1], [0], [0], [1], [0, 0, 1, 1], [], []>} : vector<8x64xf32>, vector<64x256xf32>, vector<8x256xf32> -> vector<8x256xf32>
    %114 = arith.addf %109, %113 : vector<8x256xf32>
    %c0_64 = arith.constant 0 : index
    %c145 = arith.constant 145 : index
    %115 = vector.load %arg8[%c0_64, %c145] : memref<64x512xf32, #tpu.memory_space<vmem>>, vector<64x256xf32>
    %cst_65 = arith.constant 0.000000e+00 : f32
    %116 = vector.shape_cast %53 : vector<1x256xi1> to vector<1x256xi1>
    %117 = vector.broadcast %116 : vector<1x256xi1> to vector<64x256xi1>
    %118 = vector.broadcast %cst_65 : f32 to vector<64x256xf32>
    %119 = arith.select %117, %115, %118 : vector<64x256xi1>, vector<64x256xf32>
    %c8 = arith.constant 8 : index
    %c0_66 = arith.constant 0 : index
    %c0_67 = arith.constant 0 : index
    %120 = vector.load %arg5[%c8, %c0_66, %c0_67] : memref<9x8x64xf32, #tpu.memory_space<vmem>>, vector<1x8x64xf32>
    %121 = vector.shape_cast %120 : vector<1x8x64xf32> to vector<8x64xf32>
    %cst_68 = arith.constant dense<0.000000e+00> : vector<8x256xf32>
    %122 = tpu.matmul %121, %119, %cst_68 {dimension_numbers = #tpu.dot_dimension_numbers<[1], [0], [0], [1], [0, 0, 1, 1], [], []>} : vector<8x64xf32>, vector<64x256xf32>, vector<8x256xf32> -> vector<8x256xf32>
    %123 = arith.addf %114, %122 : vector<8x256xf32>
    %c0_69 = arith.constant 0 : index
    %c0_70 = arith.constant 0 : index
    %124 = vector.load %arg6[%c0_69, %c0_70] : memref<8x1xf32, #tpu.memory_space<vmem>>, vector<8x1xf32>
    %125 = vector.broadcast %124 : vector<8x1xf32> to vector<8x256xf32>
    %126 = arith.addf %123, %125 : vector<8x256xf32>
    %127 = vector.extract_strided_slice %126 {offsets = [0, 0], sizes = [4, 256], strides = [1, 1]} : vector<8x256xf32> to vector<4x256xf32>
    %128 = vector.extract_strided_slice %126 {offsets = [4, 0], sizes = [4, 256], strides = [1, 1]} : vector<8x256xf32> to vector<4x256xf32>
    %129 = arith.mulf %17, %127 : vector<4x256xf32>
    %130 = arith.addf %129, %128 : vector<4x256xf32>
    %c0_71 = arith.constant 0 : index
    %c0_72 = arith.constant 0 : index
    %c0_73 = arith.constant 0 : index
    %131 = vector.load %arg7[%c0_71, %c0_72, %c0_73] : memref<1x4x256xf32, #tpu.memory_space<vmem>>, vector<1x4x256xf32>
    %132 = vector.shape_cast %131 : vector<1x4x256xf32> to vector<4x256xf32>
    %133 = vector.shape_cast %130 : vector<4x256xf32> to vector<1x4x256xf32>
    tpu.vector_store %arg7[%c0_71, %c0_72, %c0_73], %133 {strides = array<i32>} : memref<1x4x256xf32, #tpu.memory_space<vmem>>, vector<1x4x256xf32>,
    return
  }
  func.func @transform_0(%arg0: i32) -> (i32, i32, i32) {
    %c0_i32 = arith.constant 0 : i32
    %c0_i32_0 = arith.constant 0 : i32
    %c0_i32_1 = arith.constant 0 : i32
    return %arg0, %c0_i32, %c0_i32_0 : i32, i32, i32
  }
  func.func @transform_1(%arg0: i32) -> (i32, i32, i32) {
    %c0_i32 = arith.constant 0 : i32
    %c0_i32_0 = arith.constant 0 : i32
    %c0_i32_1 = arith.constant 0 : i32
    return %arg0, %c0_i32, %c0_i32_0 : i32, i32, i32
  }
  func.func @transform_2(%arg0: i32) -> (i32, i32) {
    %c0_i32 = arith.constant 0 : i32
    %c0_i32_0 = arith.constant 0 : i32
    %c0_i32_1 = arith.constant 0 : i32
    return %c0_i32, %c0_i32_0 : i32, i32
  }
  func.func @transform_3(%arg0: i32) -> (i32, i32) {
    %c0_i32 = arith.constant 0 : i32
    %c0_i32_0 = arith.constant 0 : i32
    %c0_i32_1 = arith.constant 0 : i32
    return %c0_i32, %c0_i32_0 : i32, i32
  }
  func.func @transform_4(%arg0: i32) -> (i32, i32, i32) {
    %c0_i32 = arith.constant 0 : i32
    %c0_i32_0 = arith.constant 0 : i32
    %c0_i32_1 = arith.constant 0 : i32
    %c0_i32_2 = arith.constant 0 : i32
    return %c0_i32, %c0_i32_0, %c0_i32_1 : i32, i32, i32
  }
  func.func @transform_5(%arg0: i32) -> (i32, i32) {
    %c0_i32 = arith.constant 0 : i32
    %c0_i32_0 = arith.constant 0 : i32
    %c0_i32_1 = arith.constant 0 : i32
    return %c0_i32, %c0_i32_0 : i32, i32
  }
  func.func @transform_6(%arg0: i32) -> (i32, i32, i32) {
    %c0_i32 = arith.constant 0 : i32
    %c0_i32_0 = arith.constant 0 : i32
    %c0_i32_1 = arith.constant 0 : i32
    return %arg0, %c0_i32, %c0_i32_0 : i32, i32, i32
  }
}

</mosaic_0001>

<bundles_post_ra>
// kernel: spade_norm.1
= control target key start
LH: loop header
LB: loop body
LE: loop exit
PB: predicated region body
PF: predicated region fallthrough
CT: control target
= control target key end

     0   :  { %s2659_s21 = smov 0   ;;  %s3978_s0 = inlined_call_operand.vmem [shape: f32[2,4,256], index: 0, kind: input, shape index: {}]   ;;  %s3979_s1 = inlined_call_operand.vmem [shape: f32[2,27,256], index: 1, kind: input, shape index: {}]   ;;  %s3980_s2 = inlined_call_operand.vmem [shape: f32[64,27], index: 2, kind: input, shape index: {}]   ;;  %s3981_s3 = inlined_call_operand.vmem [shape: f32[64,1], index: 3, kind: input, shape index: {}]   ;;  %s3982_s4 = inlined_call_operand.vmem [shape: f32[9,8,64], index: 4, kind: input, shape index: {}]   ;;  %s3983_s5 = inlined_call_operand.vmem [shape: f32[8,1], index: 5, kind: input, shape index: {}]   ;;  %s3984_s6 = inlined_call_operand.vmem [shape: f32[2,4,256], index: 6, kind: output, shape index: {}]  }
   0x1 LB: > { %s2282_s22 = sadd.s32 4294967295, %s2611_s21   ;;  %p2286_p0 = scmp.ge.s32.totalorder %s2611_s21, 1  ;;  %s2611_s21 = sphi %s2659_s21, %s16_s21  }
   0x2   : > { %p222_p1 = scmp.lt.s32.totalorder %s2611_s21, 3 }
   0x4   : > { %p223_p2 = pnand %p2286_p0, %p222_p1 }
   0x6   : > { %226 = sbr.rel (%p223_p2) target bundleno = 825 (0x339), region = 44 }
   0xb   : > { %p257_p3 = scmp.lt.s32.totalorder %s2282_s22, 1  ;;  %v3986_v0 = vmov 0.0   ;;  %v2614_v1 = vmov 0   ;;  %v332_v2 = vld [vmem:[%s3981_s3] sm:$0xff]  ;;  %vm405_vm0 = vcmask 1042432   ;;  %v333_v3 = vld [vmem:[%s3981_s3 + $0x8] sm:$0xff]  ;;  %v3985_v33 = vlaneseq }
   0xc   : > { %476 = vmatprep.mubr.f32.mxu0 %v3986_v0  ;;  %953 = vmatprep.mubr.f32.mxu1 %v3986_v0  ;;  %vm276_vm1 = vcmask 1043456   ;;  %v338_v13 = vld [vmem:[%s3981_s3 + $0x30] sm:$0xff]  ;;  %v316_v18 = vld [vmem:[%s3980_s2] sm:$0xff]  ;;  %vm380_vm2 = vcmask 220160   ;;  %v337_v19 = vld [vmem:[%s3981_s3 + $0x28] sm:$0xff]  ;;  %s2615_s12 = smov 17  }
   0xd   : > { %s4168_s22 = smov (!%p257_p3, %s2282_s22), 1  ;;  %2440 = vset.pattern.permute.xlu1 %v2614_v1  ;;  %2441 = vset.pattern.permute.xlu0 %v2614_v1  ;;  %v317_v20 = vld [vmem:[%s3980_s2 + $0x8] sm:$0xff]  ;;  %v336_v21 = vld [vmem:[%s3981_s3 + $0x20] sm:$0xff]  ;;  %v318_v22 = vld [vmem:[%s3980_s2 + $0x10] sm:$0xff]  ;;  %s2616_s19 = smov 16   ;;  %v289_v35 = vshrl.u32 %v3985_v33, 7 }
   0xe   : > { %s2419_s25 = sshll.u32 %s4168_s22, 6  ;;  %s2418_s26 = sshll.u32 %s4168_s22, 3  ;;  %342 = vperm.xlu1 %2440, %v332_v2   ;;  %v335_v23 = vld [vmem:[%s3981_s3 + $0x18] sm:$0xff]  ;;  %v334_v25 = vld [vmem:[%s3981_s3 + $0x10] sm:$0xff]  ;;  %v320_v26 = vld [vmem:[%s3980_s2 + $0x20] sm:$0xff] }
   0xf   : > { %s266_s29 = scalar_lea.vmem %s3979_s1, %s2419_s25  ;;  %s261_s8 = scalar_lea.vmem %s3978_s0, %s2418_s26  ;;  %v319_v24 = vld [vmem:[%s3980_s2 + $0x18] sm:$0xff]  ;;  %v321_v27 = vld [vmem:[%s3980_s2 + $0x28] sm:$0xff]  ;;  %v322_v29 = vld [vmem:[%s3980_s2 + $0x30] sm:$0xff]  ;;  %v2621_v31 = vmov 839922192  }
  0x10   : > { %v331_v4 = vld [vmem:[%s266_s29 + $0x38] sm:$0x7]  ;;  %v330_v5 = vld [vmem:[%s266_s29 + $0x30] sm:$0x7]  ;;  %v329_v6 = vld [vmem:[%s266_s29 + $0x28] sm:$0xff]  ;;  %s2617_s20 = smov 15   ;;  %v286_v32 = vunpack.c.l.s4 %v2621_v31  ;;  %s271_s30 = scalar_lea.vmem %s3984_s6, %s2418_s26 }
  0x11   : > { %2293 = vmatprep.subr.msk.mxu0 %vm405_vm0, %v331_v4  ;;  %v328_v7 = vld [vmem:[%s266_s29 + $0x20] sm:$0xff]  ;;  %v327_v8 = vld [vmem:[%s266_s29 + $0x18] sm:$0xff]  ;;  %v326_v10 = vld [vmem:[%s266_s29 + $0x10] sm:$0xff]  ;;  %s2618_s23 = smov 1   ;;  %s2619_s24 = smov 127  }
  0x12   : > { %2294 = vmatpush1.msk.msra.mxu0 %vm405_vm0, %v330_v5  ;;  %v2687_v9 = vld [vmem:[%s261_s8] sm:$0xff]  ;;  %347 = vperm.xlu1 %2440, %v333_v3   ;;  %v325_v14 = vld [vmem:[%s266_s29 + $0x8] sm:$0xff]  ;;  %v339_v28 = vld [vmem:[%s3981_s3 + $0x38] sm:$0xff]  ;;  %s2620_s25 = smov 113   ;;  %v287_v34 = vunpack.c.0.s8 %v286_v32  ;;  %s2622_s27 = smov 112  }
  0x13   : > { %438 = vmatprep.subr.mxu0 %v329_v6  ;;  %v274_v11 = vcombine.high %v2687_v9, %v2687_v9  ;;  %v277_v12 = vsel %vm276_vm1, %v2687_v9, 0.0  ;;  %v324_v16 = vld [vmem:[%s266_s29] sm:$0xff]  ;;  %v323_v30 = vld [vmem:[%s3980_s2 + $0x38] sm:$0xff]  ;;  %s2623_s28 = smov 111  }
  0x14   : > { %439 = vmatpush1.msra.mxu0 %v328_v7  ;;  %v2795_v36 = vsub.s32 %v287_v34, %v289_v35 }
  0x15   : > { %440 = vmatprep.subr.mxu0 %v327_v8  ;;  %v278_v15 = vsel %vm276_vm1, %v274_v11, 0.0 }
  0x16   : > { %441 = vmatpush1.msra.mxu0 %v326_v10  ;;  %v279_v17 = vadd.f32 %v278_v15, %v277_v12  ;;  %372 = vperm.xlu1 %2440, %v338_v13   ;;  %4031 = vst [vmem:[#allocation3_spill] sm:$0xff] %v2795_v36 }
  0x17   : > { %442 = vmatprep.subr.mxu0 %v325_v14 }
  0x18   : > { %280 = vadd.xlane.f32.xlu0 %v279_v17  ;;  %443 = vmatpush1.msra.mxu0 %v324_v16 }
  0x19   : > { %2295 = vmatmul.mubr.msk.f32.vlgmr.msra.gmra.mxu0 %vm380_vm2, %v316_v18 }
  0x1a   : > { %482 = vmatprep.mubr.f32.mxu0 %v3986_v0  ;;  %367 = vperm.xlu1 %2440, %v337_v19  }
  0x1d   : > { %2296 = vmatmul.mubr.msk.f32.gmra.mxu0 %vm380_vm2, %v317_v20 }
  0x1e   : > { %488 = vmatprep.mubr.f32.mxu0 %v3986_v0  ;;  %362 = vperm.xlu1 %2440, %v336_v21  }
  0x21   : > { %2297 = vmatmul.mubr.msk.f32.gmra.mxu0 %vm380_vm2, %v318_v22 }
  0x22   : > { %494 = vmatprep.mubr.f32.mxu0 %v3986_v0  ;;  %357 = vperm.xlu1 %2440, %v335_v23  }
  0x25   : > { %2298 = vmatmul.mubr.msk.f32.gmra.mxu0 %vm380_vm2, %v319_v24 }
  0x26   : > { %500 = vmatprep.mubr.f32.mxu0 %v3986_v0  ;;  %352 = vperm.xlu1 %2440, %v334_v25  }
  0x29   : > { %2299 = vmatmul.mubr.msk.f32.gmra.mxu0 %vm380_vm2, %v320_v26 }
  0x2a   : > { %506 = vmatprep.mubr.f32.mxu0 %v3986_v0  ;;  %2443 = vrot.lane.b32.xlu1 %v3986_v0, %s2615_s12 }
  0x2d   : > { %2300 = vmatmul.mubr.msk.f32.gmra.mxu0 %vm380_vm2, %v321_v27 }
  0x2e   : > { %512 = vmatprep.mubr.f32.mxu0 %v3986_v0  ;;  %377 = vperm.xlu0 %2441, %v339_v28  }
  0x2f   : > { %2448 = vrot.lane.b32.xlu1 %v3986_v0, %s2615_s12 }
  0x31   : > { %2301 = vmatmul.mubr.msk.f32.gmra.mxu0 %vm380_vm2, %v322_v29 }
  0x32   : > { %518 = vmatprep.mubr.f32.mxu0 %v3986_v0  ;;  %2453 = vrot.lane.b32.xlu0 %v3986_v0, %s2615_s12 }
  0x33   : > { %2458 = vrot.lane.b32.xlu1 %v3986_v0, %s2615_s12 }
  0x35   : > { %2302 = vmatmul.mubr.msk.f32.gmra.mxu0 %vm380_vm2, %v323_v30 }
  0x36   : > { %2463 = vrot.lane.b32.xlu0 %v3986_v0, %s2616_s19  ;;  %1204 = vmatprep.mubr.f32.mxu0 %v3986_v0 }
  0x37   : > { %2468 = vrot.lane.b32.xlu1 %v3986_v0, %s2616_s19 }
  0x3a   : > { %2473 = vrot.lane.b32.xlu0 %v3986_v0, %s2616_s19 }
  0x3b   : > { %2478 = vrot.lane.b32.xlu1 %v3986_v0, %s2616_s19 }
  0x3e   : > { %2483 = vrot.lane.b32.xlu0 %v3986_v0, %s2617_s20 }
  0x3f   : > { %2488 = vrot.lane.b32.xlu1 %v3986_v0, %s2617_s20 }
  0x42   : > { %2493 = vrot.lane.b32.xlu0 %v3986_v0, %s2617_s20 }
  0x43   : > { %2498 = vrot.lane.b32.xlu1 %v3986_v0, %s2617_s20 }
  0x46   : > { %2503 = vrot.lane.b32.xlu0 %v3986_v0, %s2618_s23 }
  0x47   : > { %2508 = vrot.lane.b32.xlu1 %v3986_v0, %s2618_s23 }
  0x4a   : > { %2513 = vrot.lane.b32.xlu0 %v3986_v0, %s2618_s23 }
  0x4b   : > { %2518 = vrot.lane.b32.xlu1 %v3986_v0, %s2618_s23 }
  0x4f   : > { %2523 = vrot.lane.b32.xlu1 %v3986_v0, %s2619_s24 }
  0x53   : > { %2528 = vrot.lane.b32.xlu1 %v3986_v0, %s2620_s25 }
  0x57   : > { %2533 = vrot.lane.b32.xlu1 %v3986_v0, %s2619_s24 }
  0x5b   : > { %2538 = vrot.lane.b32.xlu1 %v3986_v0, %s2620_s25 }
  0x5f   : > { %2543 = vrot.lane.b32.xlu1 %v3986_v0, %s2619_s24 }
  0x89   : > { %v343_v46 = vpop.permute.xlu1 %342 }
  0x8d   : > { %v348_v47 = vpop.permute.xlu1 %347 }
  0x91   : > { %v2805_v48 = vpop.permute.xlu1 %372 }
  0x95   : > { %v2807_v51 = vpop.permute.xlu1 %367 }
  0x99   : > { %v2815_v59 = vpop.permute.xlu1 %362 }
  0x9d   : > { %v358_v63 = vpop.permute.xlu1 %357 }
  0xa1   : > { %v281_v37 = vpop.xlane.xlu0 %280  ;;  %v353_v4 = vpop.permute.xlu1 %352 }
  0xa2   : > { %v283_v38 = vmul.f32 0.00390625, %v281_v37 }
  0xa4   : > { %v291_v39 = vrot.slane %v283_v38, %v2795_v36 }
  0xa5   : > { %v2855_v15 = vpop.permute.xlu1 %2443 }
  0xa6   : > { %v2799_v40 = vsub.f32 %v2687_v9, %v291_v39  ;;  %4034 = vst [vmem:[#allocation6_spill] sm:$0xff] %v2855_v15 }
  0xa8   : > { %4032 = vst [vmem:[#allocation4_spill] sm:$0xff] %v2799_v40  ;;  %v294_v41 = vmul.f32 %v2799_v40, %v2799_v40 }
  0xa9   : > { %v2865_v18 = vpop.permute.xlu1 %2448  ;;  %v2906_v34 = vpop.permute.xlu0 %377 }
  0xaa   : > { %v296_v42 = vcombine.high %v294_v41, %v294_v41  ;;  %v298_v43 = vsel %vm276_vm1, %v294_v41, 0.0  ;;  %4035 = vst [vmem:[#allocation7_spill] sm:$0xff] %v2865_v18 }
  0xac   : > { %v299_v44 = vsel %vm276_vm1, %v296_v42, 0.0 }
  0xad   : > { %v300_v45 = vadd.f32 %v299_v44, %v298_v43  ;;  %v2873_v20 = vpop.permute.xlu1 %2458  ;;  %v2919_v39 = vpop.permute.xlu0 %2453 }
  0xaf   : > { %301 = vadd.xlane.f32.xlu0 %v300_v45 }
  0xb1   : > { %v2883_v24 = vpop.permute.xlu1 %2468 }
  0xb5   : > { %v2890_v27 = vpop.permute.xlu1 %2478 }
  0xb9   : > { %v2904_v31 = vpop.permute.xlu1 %2488 }
  0xbd   : > { %v2912_v35 = vpop.permute.xlu1 %2498 }
  0xc1   : > { %v2925_v43 = vpop.permute.xlu1 %2508 }
  0xc2   : > { %4039 = vst [vmem:[#allocation11_spill] sm:$0xff] %v2925_v43 }
  0xd9   : > { %v478_v49 = vpop.f32.mrf.mxu0 }
  0xda   : > { %v479_v50 = vadd.f32 %v478_v49, %v343_v46 }
  0xdb   : > { %v480_v52 = vpop.f32.mrf.mxu0 }
  0xdc   : > { %vm525_vm3 = vcmp.ge.f32.partialorder %v479_v50, 0.0  ;;  %v541_v53 = vmul.f32 0.2, %v479_v50  ;;  %v481_v54 = vadd.f32 %v480_v52, %v343_v46  ;;  %v2930_v46 = vpop.permute.xlu0 %2463 }
  0xdd   : > { %v484_v55 = vpop.f32.mrf.mxu0 }
  0xde   : > { %v2809_v56 = vsel %vm525_vm3, %v479_v50, %v541_v53  ;;  %v542_v57 = vmul.f32 0.2, %v481_v54  ;;  %vm526_vm4 = vcmp.ge.f32.partialorder %v481_v54, 0.0  ;;  %v485_v1 = vadd.f32 %v484_v55, %v348_v47 }
  0xdf   : > { %v486_v58 = vpop.f32.mrf.mxu0  ;;  %706 = vrot.lane.b32.xlu1 %v2809_v56, %s2615_s12  ;;  %806 = vrot.lane.b32.xlu0 %v2809_v56, %s2616_s19  ;;  %vm1261_vm3 = vcmask 7168  }
  0xe0   : > { %v2817_v60 = vsel %vm526_vm4, %v481_v54, %v542_v57  ;;  %v487_v61 = vadd.f32 %v486_v58, %v348_v47  ;;  %v543_v5 = vmul.f32 0.2, %v485_v1  ;;  %vm527_vm6 = vcmp.ge.f32.partialorder %v485_v1, 0.0  ;;  %v2936_v47 = vpop.permute.xlu1 %2518  ;;  %v2942_v50 = vpop.permute.xlu0 %2473 }
  0xe1   : > { %v490_v3 = vpop.f32.mrf.mxu0  ;;  %4041 = vst [vmem:[#allocation13_spill] sm:$0xff] %v2936_v47  ;;  %vm1562_vm4 = vcmask 1039360  }
  0xe2   : > { %v544_v62 = vmul.f32 0.2, %v487_v61  ;;  %vm528_vm5 = vcmp.ge.f32.partialorder %v487_v61, 0.0  ;;  %v491_v6 = vadd.f32 %v490_v3, %v353_v4  ;;  %v2837_v8 = vsel %vm527_vm6, %v485_v1, %v543_v5 }
  0xe3   : > { %708 = vrot.lane.b32.xlu1 %v2817_v60, %s2615_s12  ;;  %1040 = vrot.lane.b32.xlu0 %v2809_v56, %s2617_s20  ;;  %v492_v7 = vpop.f32.mrf.mxu0  ;;  %vm852_vm6 = vcmask 130048  }
  0xe4   : > { %v2827_v2 = vsel %vm528_vm5, %v487_v61, %v544_v62  ;;  %v545_v9 = vmul.f32 0.2, %v491_v6  ;;  %v493_v10 = vadd.f32 %v492_v7, %v353_v4  ;;  %vm529_vm7 = vcmp.ge.f32.partialorder %v491_v6, 0.0  ;;  %v2950_v53 = vpop.permute.xlu1 %2523  ;;  %v2953_v55 = vpop.permute.xlu0 %2483 }
  0xe5   : > { %v496_v14 = vpop.f32.mrf.mxu0  ;;  %4043 = vst [vmem:[#allocation15_spill] sm:$0xff] %v2950_v53  ;;  %vm1737_vm5 = vcmask 924672  }
  0xe6   : > { %v2843_v11 = vsel %vm529_vm7, %v491_v6, %v545_v9  ;;  %v546_v12 = vmul.f32 0.2, %v493_v10  ;;  %vm530_vm8 = vcmp.ge.f32.partialorder %v493_v10, 0.0  ;;  %v497_v16 = vadd.f32 %v496_v14, %v358_v63 }
  0xe7   : > { %808 = vrot.lane.b32.xlu1 %v2817_v60, %s2616_s19  ;;  %1215 = vrot.lane.b32.xlu0 %v2809_v56, %s2618_s23  ;;  %v498_v21 = vpop.f32.mrf.mxu0  ;;  %vm1086_vm7 = vcmask 121856  }
  0xe8   : > { %v2849_v13 = vsel %vm530_vm8, %v493_v10, %v546_v12  ;;  %v547_v17 = vmul.f32 0.2, %v497_v16  ;;  %vm531_vm9 = vcmp.ge.f32.partialorder %v497_v16, 0.0  ;;  %v499_v22 = vadd.f32 %v498_v21, %v358_v63  ;;  %v2959_v57 = vpop.permute.xlu1 %2528 }
  0xe9   : > { %4033 = vst [vmem:[#allocation5_spill] sm:$0xff] %v2849_v13  ;;  %v502_v23 = vpop.f32.mrf.mxu0  ;;  %4044 = vst [vmem:[#allocation16_spill] sm:$0xff] %v2959_v57 }
  0xea   : > { %v2867_v19 = vsel %vm531_vm9, %v497_v16, %v547_v17  ;;  %v548_v25 = vmul.f32 0.2, %v499_v22  ;;  %v503_v26 = vadd.f32 %v502_v23, %v2815_v59  ;;  %vm532_vm10 = vcmp.ge.f32.partialorder %v499_v22, 0.0 }
  0xeb   : > { %1042 = vrot.lane.b32.xlu1 %v2817_v60, %s2617_s20  ;;  %814 = vrot.lane.b32.xlu0 %v2827_v2, %s2616_s19  ;;  %4036 = vst [vmem:[#allocation8_spill] sm:$0xff] %v2867_v19  ;;  %v504_v32 = vpop.f32.mrf.mxu0 }
  0xec   : > { %v2892_v28 = vsel %vm532_vm10, %v499_v22, %v548_v25  ;;  %v549_v29 = vmul.f32 0.2, %v503_v26  ;;  %vm533_vm11 = vcmp.ge.f32.partialorder %v503_v26, 0.0  ;;  %v505_v37 = vadd.f32 %v504_v32, %v2815_v59  ;;  %v2965_v59 = vpop.permute.xlu0 %2493  ;;  %v2973_v62 = vpop.permute.xlu1 %2533 }
  0xed   : > { %4037 = vst [vmem:[#allocation9_spill] sm:$0xff] %v2892_v28  ;;  %v508_v38 = vpop.f32.mrf.mxu0  ;;  %4046 = vst [vmem:[#allocation18_spill] sm:$0xff] %v2973_v62 }
  0xee   : > { %v2898_v30 = vsel %vm533_vm11, %v503_v26, %v549_v29  ;;  %v550_v41 = vmul.f32 0.2, %v505_v37  ;;  %vm534_vm12 = vcmp.ge.f32.partialorder %v505_v37, 0.0  ;;  %v509_v54 = vadd.f32 %v508_v38, %v2807_v51 }
  0xef   : > { %1217 = vrot.lane.b32.xlu1 %v2817_v60, %s2618_s23  ;;  %1048 = vrot.lane.b32.xlu0 %v2827_v2, %s2617_s20  ;;  %4038 = vst [vmem:[#allocation10_spill] sm:$0xff] %v2898_v30  ;;  %v510_v42 = vpop.f32.mrf.mxu0  ;;  %vm752_vm11 = vcmask 138240  }
  0xf0   : > { %v2927_v44 = vsel %vm534_vm12, %v505_v37, %v550_v41  ;;  %v511_v45 = vadd.f32 %v510_v42, %v2807_v51  ;;  %v551_v58 = vmul.f32 0.2, %v509_v54  ;;  %vm535_vm14 = vcmp.ge.f32.partialorder %v509_v54, 0.0  ;;  %v2976_v1 = vpop.permute.xlu0 %2503  ;;  %v2982_v3 = vpop.permute.xlu1 %2538 }
  0xf1   : > { %4040 = vst [vmem:[#allocation12_spill] sm:$0xff] %v2927_v44  ;;  %v514_v61 = vpop.f32.mrf.mxu0  ;;  %4047 = vst [vmem:[#allocation19_spill] sm:$0xff] %v2976_v1  ;;  %vm885_vm12 = vcmask 523264  }
  0xf2   : > { %v552_v49 = vmul.f32 0.2, %v511_v45  ;;  %vm536_vm13 = vcmp.ge.f32.partialorder %v511_v45, 0.0  ;;  %v2967_v51 = vsel %vm535_vm14, %v509_v54, %v551_v58  ;;  %v515_v63 = vadd.f32 %v514_v61, %v2805_v48  ;;  %4048 = vst [vmem:[#allocation20_spill] sm:$0xff] %v2982_v3 }
  0xf3   : > { %712 = vrot.lane.b32.xlu1 %v2837_v8, %s2615_s12  ;;  %1223 = vrot.lane.b32.xlu0 %v2827_v2, %s2618_s23  ;;  %4045 = vst [vmem:[#allocation17_spill] sm:$0xff] %v2967_v51  ;;  %v516_v7 = vpop.f32.mrf.mxu0  ;;  %vm2071_vm14 = vcmask 908288  }
  0xf4   : > { %v2944_v52 = vsel %vm536_vm13, %v511_v45, %v552_v49  ;;  %v553_v4 = vmul.f32 0.2, %v515_v63  ;;  %vm537_vm15 = vcmp.ge.f32.partialorder %v515_v63, 0.0  ;;  %v2988_v5 = vpop.permute.xlu0 %2513  ;;  %v2996_v9 = vpop.permute.xlu1 %2543  ;;  %v517_v12 = vadd.f32 %v516_v7, %v2805_v48 }
  0xf5   : > { %4042 = vst [vmem:[#allocation14_spill] sm:$0xff] %v2944_v52  ;;  %4049 = vst [vmem:[#allocation21_spill] sm:$0xff] %v2988_v5  ;;  %v520_v26 = vpop.f32.mrf.mxu0 }
  0xf6   : > { %v2990_v6 = vsel %vm537_vm15, %v515_v63, %v553_v4  ;;  %4051 = vst [vmem:[#allocation23_spill] sm:$0xff] %v2996_v9  ;;  %v554_v17 = vmul.f32 0.2, %v517_v12  ;;  %vm538_vm0 = vcmp.ge.f32.partialorder %v517_v12, 0.0  ;;  %v521_v37 = vadd.f32 %v520_v26, %v2906_v34 }
  0xf7   : > { %812 = vrot.lane.b32.xlu1 %v2837_v8, %s2616_s19  ;;  %718 = vrot.lane.b32.xlu0 %v2843_v11, %s2615_s12  ;;  %4050 = vst [vmem:[#allocation22_spill] sm:$0xff] %v2990_v6  ;;  %v522_v45 = vpop.f32.mrf.mxu0  ;;  %vm1914_vm15 = vcmask 916480  }
  0xf8   : > { %v3017_v22 = vsel %vm538_vm0, %v517_v12, %v554_v17  ;;  %v555_v42 = vmul.f32 0.2, %v521_v37  ;;  %vm539_vm1 = vcmp.ge.f32.partialorder %v521_v37, 0.0  ;;  %v523_v61 = vadd.f32 %v522_v45, %v2906_v34 }
  0xf9   : > { %4055 = vst [vmem:[#allocation27_spill] sm:$0xff] %v3017_v22 }
  0xfa   : > { %v3052_v58 = vsel %vm539_vm1, %v521_v37, %v555_v42  ;;  %v556_v7 = vmul.f32 0.2, %v523_v61  ;;  %vm540_vm2 = vcmp.ge.f32.partialorder %v523_v61, 0.0 }
  0xfb   : > { %1046 = vrot.lane.b32.xlu1 %v2837_v8, %s2617_s20  ;;  %820 = vrot.lane.b32.xlu0 %v2849_v13, %s2616_s19  ;;  %4060 = vst [vmem:[#allocation32_spill] sm:$0xff] %v3052_v58 }
  0xfc   : > { %v3071_v17 = vsel %vm540_vm2, %v523_v61, %v556_v7 }
  0xfd   : > { %4062 = vst [vmem:[#allocation34_spill] sm:$0xff] %v3071_v17 }
  0xff   : > { %1221 = vrot.lane.b32.xlu1 %v2837_v8, %s2618_s23  ;;  %1054 = vrot.lane.b32.xlu0 %v2849_v13, %s2617_s20 }
 0x103   : > { %714 = vrot.lane.b32.xlu1 %v2827_v2, %s2615_s12  ;;  %1229 = vrot.lane.b32.xlu0 %v2849_v13, %s2618_s23 }
 0x107   : > { %818 = vrot.lane.b32.xlu1 %v2843_v11, %s2616_s19  ;;  %724 = vrot.lane.b32.xlu0 %v2867_v19, %s2615_s12 }
 0x10b   : > { %1052 = vrot.lane.b32.xlu1 %v2843_v11, %s2617_s20  ;;  %824 = vrot.lane.b32.xlu0 %v2867_v19, %s2616_s19 }
 0x10f   : > { %1227 = vrot.lane.b32.xlu1 %v2843_v11, %s2618_s23  ;;  %1058 = vrot.lane.b32.xlu0 %v2867_v19, %s2617_s20 }
 0x113   : > { %720 = vrot.lane.b32.xlu1 %v2849_v13, %s2615_s12  ;;  %1233 = vrot.lane.b32.xlu0 %v2867_v19, %s2618_s23 }
 0x117   : > { %1532 = vrot.lane.b32.xlu1 %v2867_v19, %s2619_s24  ;;  %1534 = vrot.lane.b32.xlu0 %v2892_v28, %s2619_s24 }
 0x11b   : > { %726 = vrot.lane.b32.xlu1 %v2892_v28, %s2615_s12  ;;  %830 = vrot.lane.b32.xlu0 %v2898_v30, %s2616_s19 }
 0x11f   : > { %826 = vrot.lane.b32.xlu1 %v2892_v28, %s2616_s19  ;;  %1064 = vrot.lane.b32.xlu0 %v2898_v30, %s2617_s20 }
 0x123   : > { %1060 = vrot.lane.b32.xlu1 %v2892_v28, %s2617_s20  ;;  %1239 = vrot.lane.b32.xlu0 %v2898_v30, %s2618_s23 }
 0x127   : > { %1235 = vrot.lane.b32.xlu1 %v2892_v28, %s2618_s23  ;;  %1538 = vrot.lane.b32.xlu0 %v2898_v30, %s2619_s24 }
 0x12b   : > { %730 = vrot.lane.b32.xlu1 %v2898_v30, %s2615_s12  ;;  %732 = vrot.lane.b32.xlu0 %v2927_v44, %s2615_s12 }
 0x12f   : > { %832 = vrot.lane.b32.xlu1 %v2927_v44, %s2616_s19  ;;  %1715 = vrot.lane.b32.xlu0 %v2927_v44, %s2620_s25 }
 0x133   : > { %1066 = vrot.lane.b32.xlu1 %v2927_v44, %s2617_s20  ;;  %738 = vrot.lane.b32.xlu0 %v2944_v52, %s2615_s12 }
 0x137   : > { %1241 = vrot.lane.b32.xlu1 %v2927_v44, %s2618_s23  ;;  %838 = vrot.lane.b32.xlu0 %v2944_v52, %s2616_s19 }
 0x138   : > { %v2998_v10 = vpop.xlane.xlu0 %301 }
 0x139   : > { %4052 = vst [vmem:[#allocation24_spill] sm:$0xff] %v2998_v10  ;;  %v4068_v10 = vmov 0.0  }
 0x13b   : > { %1540 = vrot.lane.b32.xlu1 %v2927_v44, %s2619_s24  ;;  %1072 = vrot.lane.b32.xlu0 %v2944_v52, %s2617_s20 }
 0x13f   : > { %736 = vrot.lane.b32.xlu1 %v2967_v51, %s2615_s12  ;;  %1247 = vrot.lane.b32.xlu0 %v2944_v52, %s2618_s23 }
 0x143   : > { %836 = vrot.lane.b32.xlu1 %v2967_v51, %s2616_s19  ;;  %1546 = vrot.lane.b32.xlu0 %v2944_v52, %s2619_s24 }
 0x147   : > { %1070 = vrot.lane.b32.xlu1 %v2967_v51, %s2617_s20  ;;  %1721 = vrot.lane.b32.xlu0 %v2944_v52, %s2620_s25 }
 0x14b   : > { %1245 = vrot.lane.b32.xlu1 %v2967_v51, %s2618_s23  ;;  %742 = vrot.lane.b32.xlu0 %v2990_v6, %s2615_s12 }
 0x14f   : > { %1544 = vrot.lane.b32.xlu1 %v2967_v51, %s2619_s24  ;;  %1550 = vrot.lane.b32.xlu0 %v2990_v6, %s2619_s24 }
 0x151   : > { %v3005_v14 = vpop.permute.xlu1 %706  ;;  %v3007_v16 = vpop.permute.xlu0 %806 }
 0x152   : > { %4053 = vst [vmem:[#allocation25_spill] sm:$0xff] %v3005_v14 }
 0x153   : > { %1719 = vrot.lane.b32.xlu1 %v2967_v51, %s2620_s25  ;;  %1725 = vrot.lane.b32.xlu0 %v2990_v6, %s2620_s25 }
 0x155   : > { %v3013_v21 = vpop.permute.xlu1 %708  ;;  %v3015_v48 = vpop.permute.xlu0 %1040 }
 0x156   : > { %4054 = vst [vmem:[#allocation26_spill] sm:$0xff] %v3013_v21 }
 0x157   : > { %842 = vrot.lane.b32.xlu1 %v2990_v6, %s2616_s19  ;;  %844 = vrot.lane.b32.xlu0 %v3017_v22, %s2616_s19 }
 0x159   : > { %v3023_v23 = vpop.permute.xlu1 %808  ;;  %v3025_v25 = vpop.permute.xlu0 %1215 }
 0x15a   : > { %4056 = vst [vmem:[#allocation28_spill] sm:$0xff] %v3025_v25 }
 0x15b   : > { %1076 = vrot.lane.b32.xlu1 %v2990_v6, %s2617_s20  ;;  %1078 = vrot.lane.b32.xlu0 %v3017_v22, %s2617_s20 }
 0x15d   : > { %v3031_v29 = vpop.permute.xlu1 %1042  ;;  %v3033_v32 = vpop.permute.xlu0 %814 }
 0x15f   : > { %1251 = vrot.lane.b32.xlu1 %v2990_v6, %s2618_s23  ;;  %1253 = vrot.lane.b32.xlu0 %v3017_v22, %s2618_s23 }
 0x161   : > { %v3040_v38 = vpop.permute.xlu1 %1217  ;;  %v3042_v41 = vpop.permute.xlu0 %1048 }
 0x162   : > { %4057 = vst [vmem:[#allocation29_spill] sm:$0xff] %v3040_v38 }
 0x163   : > { %744 = vrot.lane.b32.xlu1 %v3017_v22, %s2615_s12  ;;  %1727 = vrot.lane.b32.xlu0 %v3017_v22, %s2620_s25 }
 0x165   : > { %v3048_v49 = vpop.permute.xlu1 %712  ;;  %v3050_v54 = vpop.permute.xlu0 %1223 }
 0x166   : > { %4058 = vst [vmem:[#allocation30_spill] sm:$0xff] %v3048_v49  ;;  %4059 = vst [vmem:[#allocation31_spill] sm:$0xff] %v3050_v54 }
 0x167   : > { %1552 = vrot.lane.b32.xlu1 %v3017_v22, %s2619_s24  ;;  %848 = vrot.lane.b32.xlu0 %v3052_v58, %s2616_s19 }
 0x169   : > { %v3059_v63 = vpop.permute.xlu1 %812  ;;  %v3061_v4 = vpop.permute.xlu0 %718 }
 0x16a   : > { %4061 = vst [vmem:[#allocation33_spill] sm:$0xff] %v3061_v4 }
 0x16b   : > { %1731 = vrot.lane.b32.xlu1 %v3052_v58, %s2620_s25  ;;  %748 = vrot.lane.b32.xlu0 %v3052_v58, %s2615_s12 }
 0x16d   : > { %v3067_v12 = vpop.permute.xlu1 %1046  ;;  %v3069_v34 = vpop.permute.xlu0 %820 }
 0x16f   : > { %850 = vrot.lane.b32.xlu1 %v3071_v17, %s2616_s19  ;;  %1082 = vrot.lane.b32.xlu0 %v3052_v58, %s2617_s20 }
 0x171   : > { %v3077_v26 = vpop.permute.xlu1 %1221  ;;  %v3079_v37 = vpop.permute.xlu0 %1054 }
 0x172   : > { %4063 = vst [vmem:[#allocation35_spill] sm:$0xff] %v3077_v26 }
 0x173   : > { %750 = vrot.lane.b32.xlu1 %v3071_v17, %s2615_s12  ;;  %1257 = vrot.lane.b32.xlu0 %v3052_v58, %s2618_s23 }
 0x175   : > { %v3085_v42 = vpop.permute.xlu1 %714  ;;  %v3087_v45 = vpop.permute.xlu0 %1229 }
 0x176   : > { %4064 = vst [vmem:[#allocation36_spill] sm:$0xff] %v3085_v42  ;;  %4065 = vst [vmem:[#allocation37_spill] sm:$0xff] %v3087_v45 }
 0x177   : > { %1084 = vrot.lane.b32.xlu1 %v3071_v17, %s2617_s20  ;;  %1556 = vrot.lane.b32.xlu0 %v3052_v58, %s2619_s24 }
 0x179   : > { %v3093_v61 = vpop.permute.xlu1 %818  ;;  %v3095_v7 = vpop.permute.xlu0 %724 }
 0x17a   : > { %4066 = vst [vmem:[#allocation38_spill] sm:$0xff] %v3095_v7 }
 0x17b   : > { %1259 = vrot.lane.b32.xlu1 %v3071_v17, %s2618_s23  ;;  %1558 = vrot.lane.b32.xlu0 %v3071_v17, %s2619_s24 }
 0x17d   : > { %v3101_v33 = vpop.permute.xlu1 %1052  ;;  %v3103_v0 = vpop.permute.xlu0 %824 }
 0x17f   : > { %1528 = vrot.lane.b32.xlu1 %v2849_v13, %s2619_s24  ;;  %1733 = vrot.lane.b32.xlu0 %v3071_v17, %s2620_s25 }
 0x181   : > { %v3109_v40 = vpop.permute.xlu1 %1227  ;;  %v3111_v36 = vpop.permute.xlu0 %1058 }
 0x182   : > { %4067 = vst [vmem:[#allocation39_spill] sm:$0xff] %v3109_v40 }
 0x183   : > { %2548 = vrot.lane.b32.xlu1 %v4068_v10, %s2620_s25  ;;  %1713 = vrot.lane.b32.xlu0 %v2898_v30, %s2620_s25 }
 0x185   : > { %v3117_v9 = vpop.permute.xlu1 %720  ;;  %v3119_v62 = vpop.permute.xlu0 %1233 }
 0x186   : > { %4069 = vst [vmem:[#allocation40_spill] sm:$0xff] %v3117_v9  ;;  %4070 = vst [vmem:[#allocation41_spill] sm:$0xff] %v3119_v62 }
 0x187   : > { %1707 = vrot.lane.b32.xlu1 %v2867_v19, %s2620_s25  ;;  %1709 = vrot.lane.b32.xlu0 %v2892_v28, %s2620_s25 }
 0x189   : > { %v3125_v53 = vpop.permute.xlu1 %1532  ;;  %v3127_v25 = vpop.permute.xlu0 %1534 }
 0x18a   : > { %4071 = vst [vmem:[#allocation42_spill] sm:$0xff] %v3125_v53  ;;  %4072 = vst [vmem:[#allocation43_spill] sm:$0xff] %v3127_v25 }
 0x18b   : > { %2553 = vrot.lane.b32.xlu1 %v4068_v10, %s2619_s24  ;;  %1526 = vrot.lane.b32.xlu0 %v2843_v11, %s2619_s24 }
 0x18d   : > { %v3133_v38 = vpop.permute.xlu1 %726  ;;  %v3135_v26 = vpop.permute.xlu0 %830 }
 0x18e   : > { %4073 = vst [vmem:[#allocation44_spill] sm:$0xff] %v3133_v38 }
 0x18f   : > { %1520 = vrot.lane.b32.xlu1 %v2837_v8, %s2619_s24  ;;  %1522 = vrot.lane.b32.xlu0 %v2827_v2, %s2619_s24 }
 0x191   : > { %v3141_v54 = vpop.permute.xlu1 %826  ;;  %v3143_v53 = vpop.permute.xlu0 %1064 }
 0x193   : > { %1516 = vrot.lane.b32.xlu1 %v2817_v60, %s2619_s24  ;;  %1703 = vrot.lane.b32.xlu0 %v2849_v13, %s2620_s25 }
 0x195   : > { %v3149_v25 = vpop.permute.xlu1 %1060  ;;  %v3151_v3 = vpop.permute.xlu0 %1239 }
 0x196   : > { %4074 = vst [vmem:[#allocation45_spill] sm:$0xff] %v3151_v3 }
 0x197   : > { %2558 = vrot.lane.b32.xlu1 %v4068_v10, %s2620_s25  ;;  %1701 = vrot.lane.b32.xlu0 %v2843_v11, %s2620_s25 }
 0x199   : > { %v3157_v47 = vpop.permute.xlu1 %1235  ;;  %v3159_v40 = vpop.permute.xlu0 %1538 }
 0x19a   : > { %4075 = vst [vmem:[#allocation46_spill] sm:$0xff] %v3157_v47  ;;  %4076 = vst [vmem:[#allocation47_spill] sm:$0xff] %v3159_v40 }
 0x19b   : > { %1695 = vrot.lane.b32.xlu1 %v2837_v8, %s2620_s25  ;;  %1697 = vrot.lane.b32.xlu0 %v2827_v2, %s2620_s25 }
 0x19d   : > { %v3165_v45 = vpop.permute.xlu1 %730  ;;  %v3167_v62 = vpop.permute.xlu0 %732 }
 0x19e   : > { %4077 = vst [vmem:[#allocation48_spill] sm:$0xff] %v3165_v45  ;;  %4078 = vst [vmem:[#allocation49_spill] sm:$0xff] %v3167_v62  ;;  %v2470_v45 = vunpack.i.l.bf16 %v2883_v24 }
 0x19f   : > { %1910 = vrot.lane.b32.xlu1 %v3071_v17, %s2622_s27  ;;  %1514 = vrot.lane.b32.xlu0 %v2809_v56, %s2619_s24 }
 0x1a1   : > { %v3173_v47 = vpop.permute.xlu1 %832  ;;  %v3175_v40 = vpop.permute.xlu0 %1715 }
 0x1a2   : > { %4079 = vst [vmem:[#allocation50_spill] sm:$0xff] %v3175_v40 }
 0x1a3   : > { %1689 = vrot.lane.b32.xlu1 %v2809_v56, %s2620_s25  ;;  %1691 = vrot.lane.b32.xlu0 %v2817_v60, %s2620_s25 }
 0x1a5   : > { %v3181_v5 = vpop.permute.xlu1 %1066  ;;  %v3183_v3 = vpop.permute.xlu0 %738 }
 0x1a7   : > { %1904 = vrot.lane.b32.xlu1 %v3017_v22, %s2622_s27  ;;  %2563 = vrot.lane.b32.xlu0 %v4068_v10, %s2622_s27 }
 0x1a9   : > { %v3189_v57 = vpop.permute.xlu1 %1241  ;;  %v3191_v43 = vpop.permute.xlu0 %838 }
 0x1aa   : > { %4080 = vst [vmem:[#allocation51_spill] sm:$0xff] %v3189_v57 }
 0x1ab   : > { %2568 = vrot.lane.b32.xlu1 %v4068_v10, %s2623_s28  ;;  %1908 = vrot.lane.b32.xlu0 %v3052_v58, %s2622_s27 }
 0x1ad   : > { %v3197_v40 = vpop.permute.xlu1 %1540  ;;  %v3199_v1 = vpop.permute.xlu0 %1072 }
 0x1ae   : > { %4081 = vst [vmem:[#allocation52_spill] sm:$0xff] %v3197_v40 }
 0x1af   : > { %2065 = vrot.lane.b32.xlu1 %v3052_v58, %s2623_s28  ;;  %2067 = vrot.lane.b32.xlu0 %v3071_v17, %s2623_s28 }
 0x1b1   : > { %v3205_v57 = vpop.permute.xlu1 %736  ;;  %v1248_v14 = vpop.permute.xlu0 %1247 }
 0x1b3   : > { %2573 = vrot.lane.b32.xlu1 %v4068_v10, %s2622_s27  ;;  %1902 = vrot.lane.b32.xlu0 %v2990_v6, %s2622_s27 }
 0x1b5   : > { %v3211_v21 = vpop.permute.xlu1 %836  ;;  %v3213_v40 = vpop.permute.xlu0 %1546 }
 0x1b6   : > { %4082 = vst [vmem:[#allocation53_spill] sm:$0xff] %v3213_v40 }
 0x1b7   : > { %1896 = vrot.lane.b32.xlu1 %v2967_v51, %s2622_s27  ;;  %1898 = vrot.lane.b32.xlu0 %v2944_v52, %s2622_s27 }
 0x1b9   : > { %v3219_v49 = vpop.permute.xlu1 %1070  ;;  %v3221_v42 = vpop.permute.xlu0 %1721 }
 0x1ba   : > { %4083 = vst [vmem:[#allocation54_spill] sm:$0xff] %v3221_v42 }
 0x1bb   : > { %1892 = vrot.lane.b32.xlu1 %v2927_v44, %s2622_s27  ;;  %2061 = vrot.lane.b32.xlu0 %v3017_v22, %s2623_s28 }
 0x1bd   : > { %v3227_v58 = vpop.permute.xlu1 %1245  ;;  %v3229_v15 = vpop.permute.xlu0 %742 }
 0x1be   : > { %4084 = vst [vmem:[#allocation55_spill] sm:$0xff] %v3227_v58  ;;  %v3233_v4 = vsel %vm1261_vm3, %v3227_v58, %v1248_v14 }
 0x1bf   : > { %4085 = vst [vmem:[#allocation56_spill] sm:$0xff] %v3233_v4  ;;  %2578 = vrot.lane.b32.xlu1 %v4068_v10, %s2623_s28  ;;  %2059 = vrot.lane.b32.xlu0 %v2990_v6, %s2623_s28 }
 0x1c1   : > { %v1545_v9 = vpop.permute.xlu1 %1544  ;;  %v1551_v17 = vpop.permute.xlu0 %1550 }
 0x1c2   : > { %v3241_v22 = vsel %vm1562_vm4, %v1545_v9, %v3213_v40 }
 0x1c3   : > { %4086 = vst [vmem:[#allocation57_spill] sm:$0xff] %v3241_v22  ;;  %2053 = vrot.lane.b32.xlu1 %v2967_v51, %s2623_s28  ;;  %2055 = vrot.lane.b32.xlu0 %v2944_v52, %s2623_s28 }
 0x1c5   : > { %v1720_v14 = vpop.permute.xlu1 %1719  ;;  %v3247_v4 = vpop.permute.xlu0 %1725 }
 0x1c6   : > { %4087 = vst [vmem:[#allocation58_spill] sm:$0xff] %v3247_v4  ;;  %v3251_v58 = vsel %vm1737_vm5, %v1720_v14, %v3221_v42 }
 0x1c7   : > { %4088 = vst [vmem:[#allocation59_spill] sm:$0xff] %v3251_v58  ;;  %2583 = vrot.lane.b32.xlu1 %v4068_v10, %s2622_s27  ;;  %1890 = vrot.lane.b32.xlu0 %v2898_v30, %s2622_s27 }
 0x1c9   : > { %v843_v9 = vpop.permute.xlu1 %842  ;;  %v845_v22 = vpop.permute.xlu0 %844 }
 0x1ca   : > { %v866_v18 = vsel %vm852_vm6, %v843_v9, %v845_v22 }
 0x1cb   : > { %1884 = vrot.lane.b32.xlu1 %v2867_v19, %s2622_s27  ;;  %1886 = vrot.lane.b32.xlu0 %v2892_v28, %s2622_s27 }
 0x1cd   : > { %v3261_v40 = vpop.permute.xlu1 %1076  ;;  %v3263_v4 = vpop.permute.xlu0 %1078 }
 0x1cf   : > { %1880 = vrot.lane.b32.xlu1 %v2849_v13, %s2622_s27  ;;  %2049 = vrot.lane.b32.xlu0 %v2927_v44, %s2623_s28 }
 0x1d1   : > { %v3269_v14 = vpop.permute.xlu1 %1251  ;;  %v3271_v58 = vpop.permute.xlu0 %1253 }
 0x1d2   : > { %4089 = vst [vmem:[#allocation60_spill] sm:$0xff] %v3269_v14  ;;  %4090 = vst [vmem:[#allocation61_spill] sm:$0xff] %v3271_v58 }
 0x1d3   : > { %2588 = vrot.lane.b32.xlu1 %v4068_v10, %s2623_s28  ;;  %2047 = vrot.lane.b32.xlu0 %v2898_v30, %s2623_s28 }
 0x1d5   : > { %v3277_v42 = vpop.permute.xlu1 %744  ;;  %v3279_v51 = vpop.permute.xlu0 %1727 }
 0x1d6   : > { %4091 = vst [vmem:[#allocation62_spill] sm:$0xff] %v3279_v51 }
 0x1d7   : > { %2041 = vrot.lane.b32.xlu1 %v2867_v19, %s2623_s28  ;;  %2043 = vrot.lane.b32.xlu0 %v2892_v28, %s2623_s28  ;;  %v4095_v19 = vlaneseq  ;;  %v2465_v28 = vunpack.i.l.bf16 %v2930_v46 }
 0x1d9   : > { %v3285_v44 = vpop.permute.xlu1 %1552  ;;  %v849_v14 = vpop.permute.xlu0 %848  ;;  %v3300_v52 = vand.u32 127, %v4095_v19  ;;  %v2466_v19 = vunpack.i.h.bf16 %v2930_v46  ;;  %v2471_v46 = vunpack.i.h.bf16 %v2883_v24 }
 0x1da   : > { %4092 = vst [vmem:[#allocation63_spill] sm:$0xff] %v3285_v44  ;;  %v3289_v58 = vsel %vm1562_vm4, %v1551_v17, %v3285_v44  ;;  %v867_v6 = vsel %vm852_vm6, %v2465_v28, %v849_v14  ;;  %v864_v28 = vsel %vm852_vm6, %v3211_v21, %v3191_v43  ;;  %v2475_v43 = vunpack.i.l.bf16 %v2942_v50 }
 0x1db   : > { %4093 = vst [vmem:[#allocation64_spill] sm:$0xff] %v3289_v58  ;;  %2593 = vrot.lane.b32.xlu1 %v4068_v10, %s2622_s27  ;;  %1878 = vrot.lane.b32.xlu0 %v2843_v11, %s2622_s27  ;;  %v3307_v44 = vadd.s32 128, %v3300_v52  ;;  %v865_v62 = vsel %vm852_vm6, %v2466_v19, %v843_v9  ;;  %v860_v9 = vsel %vm852_vm6, %v3103_v0, %v3141_v54  ;;  %v2486_v19 = vunpack.i.h.bf16 %v2953_v55 }
 0x1dd   : > { %v3295_v51 = vpop.permute.xlu1 %1731  ;;  %v3297_v30 = vpop.permute.xlu0 %748 }
 0x1de   : > { %4094 = vst [vmem:[#allocation65_spill] sm:$0xff] %v3295_v51 }
 0x1df   : > { %1872 = vrot.lane.b32.xlu1 %v2837_v8, %s2622_s27  ;;  %1874 = vrot.lane.b32.xlu0 %v2827_v2, %s2622_s27 }
 0x1e1   : > { %v851_v17 = vpop.permute.xlu1 %850  ;;  %v1083_v58 = vpop.permute.xlu0 %1082 }
 0x1e2   : > { %v868_v51 = vsel %vm852_vm6, %v849_v14, %v851_v17  ;;  %v635_v17 = vand.u32 15, %v3307_v44  ;;  %v2476_v14 = vunpack.i.h.bf16 %v2942_v50  ;;  %v858_v50 = vsel %vm852_vm6, %v3093_v61, %v3069_v34 }
 0x1e3   : > { %1868 = vrot.lane.b32.xlu1 %v2817_v60, %s2622_s27  ;;  %2037 = vrot.lane.b32.xlu0 %v2849_v13, %s2623_s28  ;;  %v628_v13 = vand.u32 15, %v3300_v52  ;;  %v2490_v34 = vunpack.i.l.bf16 %v2904_v31 }
 0x1e4   : > { %905 = vmatprep.subr.mxu1 %v868_v51  ;;  %vm3343_vm8 = vcmp.ne.s32.totalorder %v635_v17, 15  ;;  %vm3421_vm10 = vcmp.ne.s32.totalorder %v635_v17, 0 }
 0x1e5   : > { %906 = vmatpush1.msra.mxu1 %v867_v6  ;;  %v3317_v7 = vpop.permute.xlu1 %750  ;;  %v3319_v38 = vpop.permute.xlu0 %1257  ;;  %v862_v6 = vsel %vm852_vm6, %v3135_v26, %v3173_v47  ;;  %vm3353_vm9 = vcmp.ne.s32.totalorder %v628_v13, 15  ;;  %v2485_v47 = vunpack.i.l.bf16 %v2953_v55  ;;  %v857_v55 = vsel %vm852_vm6, %v2476_v14, %v3093_v61 }
 0x1e6   : > { %907 = vmatprep.subr.mxu1 %v866_v18  ;;  %v863_v18 = vsel %vm852_vm6, %v2470_v45, %v3211_v21  ;;  %v861_v21 = vsel %vm852_vm6, %v2471_v46, %v3135_v26  ;;  %v859_v26 = vsel %vm852_vm6, %v2475_v43, %v3103_v0  ;;  %v1100_v0 = vsel %vm1086_vm7, %v3261_v40, %v3263_v4 }
 0x1e7   : > { %908 = vmatpush1.msra.mxu1 %v865_v62  ;;  %2598 = vrot.lane.b32.xlu1 %v4068_v10, %s2623_s28  ;;  %v856_v4 = vsel %vm852_vm6, %v3059_v63, %v3033_v32  ;;  %v2481_v61 = vunpack.i.h.bf16 %v2890_v27  ;;  %vm3442_vm13 = vcmp.ne.s32.totalorder %v628_v13, 0  ;;  %v768_v17 = vsel %vm752_vm11, %v3297_v30, %v3317_v7  ;;  %v4162_v32 = vld [vmem:[#allocation43_spill] sm:$0xff] }
 0x1e8   : > { %2035 = vrot.lane.b32.xlu0 %v2843_v11, %s2623_s28  ;;  %909 = vmatprep.subr.mxu1 %v864_v28  ;;  %v1101_v28 = vsel %vm1086_vm7, %v2485_v47, %v1083_v58 }
 0x1e9   : > { %910 = vmatpush1.msra.mxu1 %v863_v18  ;;  %v1085_v51 = vpop.permute.xlu1 %1084  ;;  %v3336_v62 = vpop.permute.xlu0 %1556  ;;  %v1099_v18 = vsel %vm1086_vm7, %v2486_v19, %v3261_v40  ;;  %v1098_v40 = vsel %vm1086_vm7, %v3219_v49, %v3199_v1  ;;  %v854_v1 = vsel %vm852_vm6, %v3007_v16, %v3023_v23  ;;  %v2455_v19 = vunpack.i.l.bf16 %v2919_v39  ;;  %v2378_v23 = vld [vmem:[%s3982_s4 + $0x30] sm:$0xff] }
 0x1ea   : > { %v1102_v22 = vsel %vm1086_vm7, %v1083_v58, %v1085_v51  ;;  %911 = vmatprep.subr.mxu1 %v862_v6  ;;  %v2480_v58 = vunpack.i.l.bf16 %v2890_v27  ;;  %v1097_v27 = vsel %vm1086_vm7, %v2490_v34, %v3219_v49  ;;  %v853_v49 = vsel %vm852_vm6, %v2481_v61, %v3007_v16  ;;  %v4108_v61 = vld [vmem:[#allocation38_spill] sm:$0xff] }
 0x1eb   : > { %912 = vmatpush1.msra.mxu1 %v861_v21  ;;  %2029 = vrot.lane.b32.xlu1 %v2837_v8, %s2623_s28  ;;  %v2461_v16 = vunpack.i.h.bf16 %v2873_v20  ;;  %v2496_v21 = vunpack.i.h.bf16 %v2965_v59 }
 0x1ec   : > { %2031 = vrot.lane.b32.xlu0 %v2827_v2, %s2623_s28  ;;  %913 = vmatprep.subr.mxu1 %v860_v9  ;;  %v855_v51 = vsel %vm852_vm6, %v2480_v58, %v3059_v63  ;;  %v2495_v63 = vunpack.i.l.bf16 %v2965_v59  ;;  %v2198_v59 = vld [vmem:[%s3983_s5] sm:$0xff] }
 0x1ed   : > { %2323 = vmatprep.subr.msk.mxu0 %vm3343_vm8, %v1102_v22  ;;  %914 = vmatpush1.msra.mxu1 %v859_v26  ;;  %v3372_v46 = vpop.permute.xlu1 %1259  ;;  %v3374_v54 = vpop.permute.xlu0 %1558  ;;  %v2491_v22 = vunpack.i.h.bf16 %v2904_v31  ;;  %v1096_v31 = vsel %vm1086_vm7, %v3143_v53, %v3181_v5  ;;  %v2303_v5 = vld [vmem:[%s3982_s4 + $0x8] sm:$0xff]  ;;  %v767_v7 = vsel %vm752_vm11, %v2461_v16, %v3297_v30  ;;  %v1091_v9 = vsel %vm1086_vm7, %v2496_v21, %v3101_v33  ;;  %v4115_v21 = vld [vmem:[#allocation30_spill] sm:$0xff] }
 0x1ee   : > { %2324 = vmatpush1.msk.msra.mxu0 %vm3353_vm9, %v1101_v28  ;;  %915 = vmatprep.subr.mxu1 %v858_v50  ;;  %v1093_v47 = vsel %vm1086_vm7, %v2495_v63, %v3111_v36  ;;  %v2456_v30 = vunpack.i.h.bf16 %v2919_v39  ;;  %v764_v26 = vsel %vm752_vm11, %v3205_v57, %v3183_v3  ;;  %v2501_v28 = vunpack.i.h.bf16 %v2912_v35  ;;  %v4105_v39 = vld [vmem:[#allocation48_spill] sm:$0xff] }
 0x1ef   : > { %2325 = vmatprep.subr.msk.mxu0 %vm3343_vm8, %v1100_v0  ;;  %916 = vmatpush1.msra.mxu1 %v857_v55  ;;  %v1095_v44 = vsel %vm1086_vm7, %v2491_v22, %v3143_v53  ;;  %v1094_v53 = vsel %vm1086_vm7, %v3111_v36, %v3149_v25  ;;  %v2460_v25 = vunpack.i.l.bf16 %v2873_v20  ;;  %v1092_v36 = vsel %vm1086_vm7, %v3101_v33, %v3079_v37  ;;  %v4109_v22 = vld [vmem:[#allocation34_spill] sm:$0xff] }
 0x1f0   : > { %2326 = vmatpush1.msk.msra.mxu0 %vm3353_vm9, %v1099_v18  ;;  %2023 = vrot.lane.b32.xlu1 %v2809_v56, %s2623_s28  ;;  %v766_v20 = vsel %vm752_vm11, %v3229_v15, %v3277_v42  ;;  %v2500_v37 = vunpack.i.l.bf16 %v2912_v35  ;;  %v763_v0 = vsel %vm752_vm11, %v2456_v30, %v3205_v57  ;;  %v1088_v3 = vsel %vm1086_vm7, %v3015_v48, %v3031_v29  ;;  %v4106_v57 = vld [vmem:[#allocation7_spill] sm:$0xff]  ;;  %v2322_v29 = vld [vmem:[%s3982_s4 + $0x10] sm:$0xff] }
 0x1f1   : > { %1866 = vrot.lane.b32.xlu0 %v2809_v56, %s2622_s27  ;;  %917 = vmatprep.subr.mxu1 %v856_v4  ;;  %v3407_v6 = vpop.permute.xlu1 %1528  ;;  %v3409_v43 = vpop.permute.xlu0 %1733  ;;  %v765_v14 = vsel %vm752_vm11, %v2460_v25, %v3229_v15  ;;  %v1090_v15 = vsel %vm1086_vm7, %v3067_v12, %v3042_v41  ;;  %v4104_v41 = vld [vmem:[#allocation49_spill] sm:$0xff]  ;;  %v1087_v55 = vsel %vm1086_vm7, %v2501_v28, %v3015_v48  ;;  %v4107_v4 = vld [vmem:[#allocation44_spill] sm:$0xff]  ;;  %v4116_v25 = vld [vmem:[#allocation27_spill] sm:$0xff] }
 0x1f2   : > { %2327 = vmatprep.subr.msk.mxu0 %vm3343_vm8, %v1098_v40  ;;  %918 = vmatpush1.msra.mxu1 %v855_v51  ;;  %v1089_v50 = vsel %vm1086_vm7, %v2500_v37, %v3067_v12  ;;  %v762_v35 = vsel %vm752_vm11, %v4105_v39, %v4104_v41  ;;  %v2451_v12 = vunpack.i.h.bf16 %v4106_v57  ;;  %v761_v58 = vsel %vm752_vm11, %v2455_v19, %v4105_v39  ;;  %v4120_v37 = vld [vmem:[#allocation14_spill] sm:$0xff]  ;;  %v4122_v28 = vld [vmem:[#allocation12_spill] sm:$0xff] }
 0x1f3   : > { %2328 = vmatpush1.msk.msra.mxu0 %vm3353_vm9, %v1097_v27  ;;  %919 = vmatprep.subr.mxu1 %v854_v1  ;;  %v760_v48 = vsel %vm752_vm11, %v4108_v61, %v4107_v4  ;;  %v2450_v40 = vunpack.i.l.bf16 %v4106_v57  ;;  %v4110_v27 = vld [vmem:[#allocation40_spill] sm:$0xff]  ;;  %v4111_v1 = vld [vmem:[#allocation33_spill] sm:$0xff]  ;;  %v1277_v41 = vsel %vm1261_vm3, %v3319_v38, %v3372_v46  ;;  %v4124_v39 = vld [vmem:[#allocation10_spill] sm:$0xff] }
 0x1f4   : > { %2329 = vmatprep.subr.msk.mxu0 %vm3343_vm8, %v1096_v31  ;;  %920 = vmatpush1.msra.mxu1 %v853_v49  ;;  %v759_v51 = vsel %vm752_vm11, %v2451_v12, %v4108_v61  ;;  %v758_v31 = vsel %vm752_vm11, %v4111_v1, %v4110_v27  ;;  %v4112_v49 = vld [vmem:[#allocation6_spill] sm:$0xff]  ;;  %v4128_v4 = vld [vmem:[#allocation60_spill] sm:$0xff]  ;;  %v4131_v27 = vld [vmem:[#allocation55_spill] sm:$0xff] }
 0x1f5   : > { %2330 = vmatpush1.msk.msra.mxu0 %vm3353_vm9, %v1095_v44  ;;  %2025 = vrot.lane.b32.xlu0 %v2817_v60, %s2623_s28  ;;  %v3457_v13 = vpop.permute.xlu1 %2548  ;;  %v3459_v52 = vpop.permute.xlu0 %1713  ;;  %v2446_v63 = vunpack.i.h.bf16 %v4112_v49  ;;  %v757_v44 = vsel %vm752_vm11, %v2450_v40, %v4111_v1  ;;  %v4130_v40 = vld [vmem:[#allocation11_spill] sm:$0xff] }
 0x1f6   : > { %2305 = vmatprep.subr.msk.mxu1 %vm3421_vm10, %v768_v17  ;;  %2331 = vmatprep.subr.msk.mxu0 %vm3343_vm8, %v1094_v53  ;;  %v4114_v17 = vld [vmem:[#allocation36_spill] sm:$0xff] }
 0x1f7   : > { %2304 = vmatmul.mubr.msk.f32.vlgmr.msra.gmra.mxu1 %vm885_vm12, %v2303_v5  ;;  %2332 = vmatpush1.msk.msra.mxu0 %vm3353_vm9, %v1093_v47  ;;  %v4113_v5 = vld [vmem:[#allocation32_spill] sm:$0xff]  ;;  %v756_v47 = vsel %vm752_vm11, %v4115_v21, %v4114_v17  ;;  %v4135_v17 = vld [vmem:[#allocation45_spill] sm:$0xff] }
 0x1f8   : > { %2306 = vmatpush1.msk.msra.mxu1 %vm3442_vm13, %v767_v7  ;;  %2333 = vmatprep.subr.msk.mxu0 %vm3343_vm8, %v1092_v36  ;;  %v2445_v7 = vunpack.i.l.bf16 %v4112_v49  ;;  %v755_v36 = vsel %vm752_vm11, %v2446_v63, %v4115_v21  ;;  %v4136_v21 = vld [vmem:[#allocation21_spill] sm:$0xff] }
 0x1f9   : > { %2307 = vmatprep.subr.msk.mxu1 %vm3421_vm10, %v766_v20  ;;  %2334 = vmatpush1.msk.msra.mxu0 %vm3353_vm9, %v1091_v9  ;;  %v3497_v33 = vpop.permute.xlu1 %1707  ;;  %v3499_v42 = vpop.permute.xlu0 %1709  ;;  %v4118_v9 = vld [vmem:[#allocation26_spill] sm:$0xff]  ;;  %v4119_v20 = vld [vmem:[#allocation25_spill] sm:$0xff] }
 0x1fa   : > { %2308 = vmatpush1.msk.msra.mxu1 %vm3442_vm13, %v765_v14  ;;  %2201 = vperm.xlu0 %2441, %v2198_v59   ;;  %v4117_v59 = vld [vmem:[#allocation22_spill] sm:$0xff]  ;;  %v754_v30 = vsel %vm752_vm11, %v4119_v20, %v4118_v9  ;;  %v753_v14 = vsel %vm752_vm11, %v2445_v7, %v4119_v20  ;;  %v2516_v9 = vunpack.i.h.bf16 %v4136_v21 }
 0x1fb   : > { %2309 = vmatprep.subr.msk.mxu1 %vm3421_vm10, %v764_v26  ;;  %2335 = vmatprep.subr.msk.mxu0 %vm3343_vm8, %v1090_v15  ;;  %v4121_v26 = vld [vmem:[#allocation17_spill] sm:$0xff]  ;;  %v4137_v7 = vld [vmem:[#allocation46_spill] sm:$0xff] }
 0x1fc   : > { %2310 = vmatpush1.msk.msra.mxu1 %vm3442_vm13, %v763_v0  ;;  %2336 = vmatpush1.msk.msra.mxu0 %vm3353_vm9, %v1089_v50  ;;  %v801_v50 = vld [vmem:[%s3982_s4] sm:$0xff] }
 0x1fd   : > { %2311 = vmatprep.subr.msk.mxu1 %vm3421_vm10, %v762_v35  ;;  %2337 = vmatprep.subr.msk.mxu0 %vm3343_vm8, %v1088_v3  ;;  %v3541_v18 = vpop.permute.xlu1 %2553  ;;  %v3543_v34 = vpop.permute.xlu0 %1526  ;;  %v4123_v0 = vld [vmem:[#allocation19_spill] sm:$0xff]  ;;  %v4125_v35 = vld [vmem:[#allocation9_spill] sm:$0xff] }
 0x1fe   : > { %2312 = vmatpush1.msk.msra.mxu1 %vm3442_vm13, %v761_v58  ;;  %2338 = vmatpush1.msk.msra.mxu0 %vm3353_vm9, %v1087_v55  ;;  %v2505_v3 = vunpack.i.l.bf16 %v4123_v0  ;;  %v2506_v57 = vunpack.i.h.bf16 %v4123_v0  ;;  %v4126_v55 = vld [vmem:[#allocation8_spill] sm:$0xff] }
 0x1ff   : > { %2313 = vmatprep.subr.msk.mxu1 %vm3421_vm10, %v760_v48  ;;  %1409 = vmatprep.subr.mxu0 %v4109_v22  ;;  %v4129_v48 = vld [vmem:[#allocation5_spill] sm:$0xff]  ;;  %v2511_v22 = vunpack.i.h.bf16 %v4130_v40 }
 0x200   : > { %2314 = vmatpush1.msk.msra.mxu1 %vm3442_vm13, %v759_v51  ;;  %2339 = vmatmul.mubr.msk.f32.vlgmr.msra.gmra.mxu0 %vm885_vm12, %v2322_v29  ;;  %v1276_v12 = vsel %vm1261_vm3, %v2505_v3, %v3319_v38  ;;  %v4127_v29 = vld [vmem:[#allocation61_spill] sm:$0xff]  ;;  %v2510_v51 = vunpack.i.l.bf16 %v4130_v40  ;;  %v1274_v38 = vsel %vm1261_vm3, %v2506_v57, %v4128_v4 }
 0x201   : > { %1410 = vmatpush1.msra.mxu0 %v4113_v5  ;;  %2315 = vmatprep.subr.msk.mxu1 %vm3421_vm10, %v758_v31  ;;  %v3570_v16 = vpop.permute.xlu1 %1520  ;;  %v3572_v53 = vpop.permute.xlu0 %1522  ;;  %v1275_v61 = vsel %vm1261_vm3, %v4128_v4, %v4127_v29  ;;  %v4132_v31 = vld [vmem:[#allocation56_spill] sm:$0xff]  ;;  %v4134_v5 = vld [vmem:[#allocation51_spill] sm:$0xff]  ;;  %v4142_v3 = vld [vmem:[#allocation13_spill] sm:$0xff] }
 0x202   : > { %1411 = vmatprep.subr.mxu0 %v4116_v25  ;;  %2316 = vmatpush1.msk.msra.mxu1 %vm3442_vm13, %v757_v44  ;;  %v1272_v1 = vsel %vm1261_vm3, %v2510_v51, %v4131_v27  ;;  %v2358_v25 = vld [vmem:[%s3982_s4 + $0x20] sm:$0xff]  ;;  %v4145_v29 = vld [vmem:[#allocation58_spill] sm:$0xff] }
 0x203   : > { %1412 = vmatpush1.msra.mxu0 %v4117_v59  ;;  %2317 = vmatprep.subr.msk.mxu1 %vm3421_vm10, %v756_v47  ;;  %v2515_v47 = vunpack.i.l.bf16 %v4136_v21 }
 0x204   : > { %1413 = vmatprep.subr.mxu0 %v4120_v37  ;;  %2318 = vmatpush1.msk.msra.mxu1 %vm3442_vm13, %v755_v36  ;;  %v4138_v36 = vld [vmem:[#allocation41_spill] sm:$0xff] }
 0x205   : > { %1414 = vmatpush1.msra.mxu0 %v4121_v26  ;;  %2319 = vmatprep.subr.msk.mxu1 %vm3421_vm10, %v754_v30  ;;  %v3597_v15 = vpop.permute.xlu1 %1516  ;;  %v3599_v19 = vpop.permute.xlu0 %1703  ;;  %v1269_v59 = vsel %vm1261_vm3, %v4138_v36, %v4137_v7  ;;  %v1268_v20 = vsel %vm1261_vm3, %v2515_v47, %v4138_v36 }
 0x206   : > { %1415 = vmatprep.subr.mxu0 %v4122_v28  ;;  %2320 = vmatpush1.msk.msra.mxu1 %vm3442_vm13, %v753_v14  ;;  %v4139_v14 = vld [vmem:[#allocation65_spill] sm:$0xff] }
 0x207   : > { %1416 = vmatpush1.msra.mxu0 %v4124_v39  ;;  %1027 = vmatprep.mubr.f32.mxu1 %v4068_v10  ;;  %v1752_v26 = vsel %vm1737_vm5, %v4139_v14, %v3409_v43  ;;  %v4140_v28 = vld [vmem:[#allocation37_spill] sm:$0xff]  ;;  %v4143_v39 = vld [vmem:[#allocation20_spill] sm:$0xff] }
 0x208   : > { %2341 = vmatprep.subr.msk.mxu1 %vm3421_vm10, %v1277_v41  ;;  %1417 = vmatprep.subr.mxu0 %v4125_v35  ;;  %v2520_v41 = vunpack.i.l.bf16 %v4142_v3  ;;  %v2540_v35 = vunpack.i.l.bf16 %v4143_v39  ;;  %v2541_v51 = vunpack.i.h.bf16 %v4143_v39 }
 0x209   : > { %2321 = vmatmul.mubr.msk.f32.vlgmr.msra.gmra.mxu1 %vm885_vm12, %v801_v50  ;;  %1418 = vmatpush1.msra.mxu0 %v4126_v55  ;;  %v3621_v58 = vpop.permute.xlu1 %2558  ;;  %v3623_v46 = vpop.permute.xlu0 %1701  ;;  %v4141_v50 = vld [vmem:[#allocation39_spill] sm:$0xff] }
 0x20a   : > { %2342 = vmatpush1.msk.msra.mxu1 %vm3442_vm13, %v1276_v12  ;;  %1419 = vmatprep.subr.mxu0 %v4129_v48  ;;  %v1267_v0 = vsel %vm1261_vm3, %v4141_v50, %v4140_v28  ;;  %v1266_v57 = vsel %vm1261_vm3, %v2516_v9, %v4141_v50  ;;  %v4144_v12 = vld [vmem:[#allocation62_spill] sm:$0xff]  ;;  %v4147_v48 = vld [vmem:[#allocation35_spill] sm:$0xff]  ;;  %v2551_v9 = vunpack.i.h.bf16 %v3457_v13  ;;  %v1577_v28 = vsel %vm1562_vm4, %v3336_v62, %v3374_v54 }
 0x20b   : > { %2343 = vmatprep.subr.msk.mxu1 %vm3421_vm10, %v1275_v61  ;;  %1420 = vmatpush1.msra.mxu0 %v2843_v11  ;;  %v4133_v11 = vld [vmem:[#allocation16_spill] sm:$0xff]  ;;  %v1750_v4 = vsel %vm1737_vm5, %v4145_v29, %v4144_v12  ;;  %v4146_v61 = vld [vmem:[#allocation31_spill] sm:$0xff]  ;;  %v2561_v62 = vunpack.i.h.bf16 %v3621_v58 }
 0x20c   : > { %2344 = vmatpush1.msk.msra.mxu1 %vm3442_vm13, %v1274_v38  ;;  %1421 = vmatprep.subr.mxu0 %v2827_v2  ;;  %v2530_v44 = vunpack.i.l.bf16 %v4133_v11  ;;  %v1271_v2 = vsel %vm1261_vm3, %v4135_v17, %v4134_v5  ;;  %v1265_v40 = vsel %vm1261_vm3, %v4147_v48, %v4146_v61  ;;  %v1264_v38 = vsel %vm1261_vm3, %v2520_v41, %v4147_v48  ;;  %v4150_v5 = vld [vmem:[#allocation28_spill] sm:$0xff]  ;;  %v4158_v29 = vld [vmem:[#allocation23_spill] sm:$0xff]  ;;  %v4160_v48 = vld [vmem:[#allocation57_spill] sm:$0xff] }
 0x20d   : > { %2345 = vmatprep.subr.msk.mxu1 %vm3421_vm10, %v4132_v31  ;;  %1422 = vmatpush1.msra.mxu0 %v2837_v8  ;;  %v3647_v49 = vpop.permute.xlu1 %1695  ;;  %v3649_v63 = vpop.permute.xlu0 %1697  ;;  %v1270_v8 = vsel %vm1261_vm3, %v2511_v22, %v4135_v17  ;;  %v4148_v22 = vld [vmem:[#allocation54_spill] sm:$0xff]  ;;  %v1743_v50 = vsel %vm1737_vm5, %v3599_v19, %v2551_v9  ;;  %v1742_v41 = vsel %vm1737_vm5, %v3623_v46, %v3599_v19 }
 0x20e   : > { %2346 = vmatpush1.msk.msra.mxu1 %vm3442_vm13, %v1272_v1  ;;  %1423 = vmatprep.subr.mxu0 %v2817_v60  ;;  %v1753_v60 = vsel %vm1737_vm5, %v3409_v43, %v2530_v44  ;;  %v2521_v43 = vunpack.i.h.bf16 %v4142_v3  ;;  %v1749_v27 = vsel %vm1737_vm5, %v4148_v22, %v2540_v35  ;;  %v2550_v1 = vunpack.i.l.bf16 %v3457_v13  ;;  %v4149_v44 = vld [vmem:[#allocation29_spill] sm:$0xff] }
 0x20f   : > { %2347 = vmatprep.subr.msk.mxu1 %vm3421_vm10, %v1271_v2  ;;  %1424 = vmatpush1.msra.mxu0 %v2809_v56  ;;  %v2531_v56 = vunpack.i.h.bf16 %v4133_v11  ;;  %v1263_v17 = vsel %vm1261_vm3, %v4150_v5, %v4149_v44  ;;  %v4151_v2 = vld [vmem:[#allocation15_spill] sm:$0xff]  ;;  %v1744_v13 = vsel %vm1737_vm5, %v3497_v33, %v3499_v42  ;;  %v4156_v35 = vld [vmem:[#allocation53_spill] sm:$0xff]  ;;  %v4163_v44 = vld [vmem:[#allocation42_spill] sm:$0xff] }
 0x210   : > { %2348 = vmatpush1.msk.msra.mxu1 %vm3442_vm13, %v1270_v8  ;;  %1457 = vmatprep.mubr.f32.mxu0 %v4068_v10  ;;  %v2525_v21 = vunpack.i.l.bf16 %v4151_v2  ;;  %v1262_v47 = vsel %vm1261_vm3, %v2521_v43, %v4150_v5  ;;  %v4152_v8 = vld [vmem:[#allocation59_spill] sm:$0xff]  ;;  %v1569_v5 = vsel %vm1562_vm4, %v4163_v44, %v4162_v32 }
 0x211   : > { %2349 = vmatprep.subr.msk.mxu1 %vm3421_vm10, %v1269_v59  ;;  %2379 = vmatprep.subr.msk.mxu0 %vm3421_vm10, %v1753_v60  ;;  %v3683_v30 = vpop.permute.xlu1 %1910  ;;  %v3685_v37 = vpop.permute.xlu0 %1514  ;;  %v1751_v55 = vsel %vm1737_vm5, %v4144_v12, %v2531_v56  ;;  %v2340_v59 = vld [vmem:[%s3982_s4 + $0x18] sm:$0xff]  ;;  %v1745_v56 = vsel %vm1737_vm5, %v3499_v42, %v2550_v1  ;;  %v4155_v42 = vld [vmem:[#allocation63_spill] sm:$0xff]  ;;  %v4157_v12 = vld [vmem:[#allocation64_spill] sm:$0xff]  ;;  %v2555_v1 = vunpack.i.l.bf16 %v3541_v18 }
 0x212   : > { %2350 = vmatpush1.msk.msra.mxu1 %vm3442_vm13, %v1268_v20  ;;  %2359 = vmatmul.mubr.msk.f32.vlgmr.msra.gmra.mxu0 %vm885_vm12, %v2358_v25  ;;  %v4153_v25 = vld [vmem:[#allocation50_spill] sm:$0xff]  ;;  %v1578_v60 = vsel %vm1562_vm4, %v3374_v54, %v2525_v21  ;;  %v2556_v21 = vunpack.i.h.bf16 %v3541_v18 }
 0x213   : > { %2380 = vmatpush1.msk.msra.mxu0 %vm3442_vm13, %v1752_v26  ;;  %2351 = vmatprep.subr.msk.mxu1 %vm3421_vm10, %v1267_v0  ;;  %v1747_v7 = vsel %vm1737_vm5, %v4153_v25, %v2541_v51  ;;  %v1746_v36 = vsel %vm1737_vm5, %v3459_v52, %v4153_v25  ;;  %v2560_v52 = vunpack.i.l.bf16 %v3621_v58  ;;  %v2526_v26 = vunpack.i.h.bf16 %v4151_v2  ;;  %v4154_v0 = vld [vmem:[#allocation18_spill] sm:$0xff] }
 0x214   : > { %2381 = vmatprep.subr.msk.mxu0 %vm3421_vm10, %v1751_v55  ;;  %2352 = vmatpush1.msk.msra.mxu1 %vm3442_vm13, %v1266_v57  ;;  %v2535_v33 = vunpack.i.l.bf16 %v4154_v0  ;;  %v2536_v46 = vunpack.i.h.bf16 %v4154_v0  ;;  %v1740_v58 = vsel %vm1737_vm5, %v3647_v49, %v3649_v63  ;;  %v2545_v49 = vunpack.i.l.bf16 %v4158_v29 }
 0x215   : > { %2382 = vmatpush1.msk.msra.mxu0 %vm3442_vm13, %v1750_v4  ;;  %2353 = vmatprep.subr.msk.mxu1 %vm3421_vm10, %v1265_v40  ;;  %v1690_v31 = vpop.permute.xlu1 %1689  ;;  %v1692_v11 = vpop.permute.xlu0 %1691  ;;  %v1576_v3 = vsel %vm1562_vm4, %v4155_v42, %v2526_v26  ;;  %v1741_v54 = vsel %vm1737_vm5, %v3649_v63, %v2560_v52  ;;  %v4159_v63 = vld [vmem:[#allocation52_spill] sm:$0xff]  ;;  %v4161_v40 = vld [vmem:[#allocation47_spill] sm:$0xff]  ;;  %v1566_v18 = vsel %vm1562_vm4, %v3572_v53, %v2555_v1 }
 0x216   : > { %2383 = vmatprep.subr.msk.mxu0 %vm3421_vm10, %v1749_v27  ;;  %2354 = vmatpush1.msk.msra.mxu1 %vm3442_vm13, %v1264_v38  ;;  %v1574_v57 = vsel %vm1562_vm4, %v4156_v35, %v2535_v33  ;;  %v1739_v43 = vsel %vm1737_vm5, %v1692_v11, %v2561_v62  ;;  %v1572_v4 = vsel %vm1562_vm4, %v4159_v63, %v2536_v46  ;;  %v2546_v27 = vunpack.i.h.bf16 %v4158_v29 }
 0x217   : > { %2384 = vmatpush1.msk.msra.mxu0 %vm3442_vm13, %v4152_v8  ;;  %2355 = vmatprep.subr.msk.mxu1 %vm3421_vm10, %v1263_v17  ;;  %v1738_v61 = vsel %vm1737_vm5, %v1690_v31, %v1692_v11  ;;  %v1571_v51 = vsel %vm1562_vm4, %v4161_v40, %v4159_v63  ;;  %v1570_v31 = vsel %vm1562_vm4, %v4162_v32, %v2545_v49 }
 0x218   : > { %2385 = vmatprep.subr.msk.mxu0 %vm3421_vm10, %v1747_v7  ;;  %2356 = vmatpush1.msk.msra.mxu1 %vm3442_vm13, %v1262_v47  ;;  %v1568_v2 = vsel %vm1562_vm4, %v3407_v6, %v2546_v27  ;;  %v1567_v47 = vsel %vm1562_vm4, %v3543_v34, %v3407_v6  ;;  %v1565_v6 = vsel %vm1562_vm4, %v3570_v16, %v3572_v53 }
 0x219   : > { %2386 = vmatpush1.msk.msra.mxu0 %vm3442_vm13, %v1746_v36  ;;  %1379 = vmatprep.mubr.f32.mxu1 %v4068_v10  ;;  %v3763_v20 = vpop.permute.xlu1 %1904  ;;  %v3765_v14 = vpop.permute.xlu0 %2563  ;;  %v1564_v34 = vsel %vm1562_vm4, %v3597_v15, %v2556_v21  ;;  %v1563_v16 = vsel %vm1562_vm4, %v3685_v37, %v3597_v15 }
 0x21a   : > { %2361 = vmatprep.subr.msk.mxu1 %vm3343_vm8, %v1578_v60  ;;  %2387 = vmatprep.subr.msk.mxu0 %vm3421_vm10, %v1745_v56  ;;  %v2565_v7 = vunpack.i.l.bf16 %v3765_v14  ;;  %v2566_v36 = vunpack.i.h.bf16 %v3765_v14 }
 0x21b   : > { %2357 = vmatmul.mubr.msk.f32.vlgmr.msra.gmra.mxu1 %vm885_vm12, %v2340_v59  ;;  %2388 = vmatpush1.msk.msra.mxu0 %vm3442_vm13, %v1744_v13  ;;  %v2360_v59 = vld [vmem:[%s3982_s4 + $0x28] sm:$0xff] }
 0x21c   : > { %2362 = vmatpush1.msk.msra.mxu1 %vm3353_vm9, %v1577_v28  ;;  %2389 = vmatprep.subr.msk.mxu0 %vm3421_vm10, %v1743_v50  ;;  %v1930_v56 = vsel %vm1914_vm15, %v3683_v30, %v2565_v7  ;;  %v1928_v26 = vsel %vm1914_vm15, %v3763_v20, %v2566_v36 }
 0x21d   : > { %2363 = vmatprep.subr.msk.mxu1 %vm3343_vm8, %v1576_v3  ;;  %2390 = vmatpush1.msk.msra.mxu0 %vm3442_vm13, %v1742_v41  ;;  %v3800_v39 = vpop.permute.xlu1 %2568  ;;  %v1909_v19 = vpop.permute.xlu0 %1908 }
 0x21e   : > { %2364 = vmatpush1.msk.msra.mxu1 %vm3353_vm9, %v4157_v12  ;;  %2391 = vmatprep.subr.msk.mxu0 %vm3421_vm10, %v1741_v54  ;;  %v2570_v55 = vunpack.i.l.bf16 %v3800_v39  ;;  %v1929_v14 = vsel %vm1914_vm15, %v1909_v19, %v3683_v30  ;;  %v2571_v37 = vunpack.i.h.bf16 %v3800_v39 }
 0x21f   : > { %2365 = vmatprep.subr.msk.mxu1 %vm3343_vm8, %v1574_v57  ;;  %2392 = vmatpush1.msk.msra.mxu0 %vm3442_vm13, %v1740_v58 }
 0x220   : > { %2366 = vmatpush1.msk.msra.mxu1 %vm3353_vm9, %v4160_v48  ;;  %2393 = vmatprep.subr.msk.mxu0 %vm3421_vm10, %v1739_v43 }
 0x221   : > { %2367 = vmatprep.subr.msk.mxu1 %vm3343_vm8, %v1572_v4  ;;  %2394 = vmatpush1.msk.msra.mxu0 %vm3442_vm13, %v1738_v61  ;;  %v2066_v38 = vpop.permute.xlu1 %2065  ;;  %v2068_v22 = vpop.permute.xlu0 %2067 }
 0x222   : > { %2368 = vmatpush1.msk.msra.mxu1 %vm3353_vm9, %v1571_v51  ;;  %v2087_v11 = vsel %vm2071_vm14, %v2068_v22, %v2570_v55  ;;  %1680 = vmatprep.mubr.f32.mxu1 %v4068_v10  ;;  %v2086_v17 = vsel %vm2071_vm14, %v2066_v38, %v2068_v22 }
 0x223   : > { %2369 = vmatprep.subr.msk.mxu1 %vm3343_vm8, %v1570_v31  ;;  %1855 = vmatprep.mubr.f32.mxu0 %v4068_v10 }
 0x224   : > { %2370 = vmatpush1.msk.msra.mxu1 %vm3353_vm9, %v1569_v5  ;;  %2399 = vmatprep.subr.msk.mxu0 %vm3343_vm8, %v2087_v11 }
 0x225   : > { %2371 = vmatprep.subr.msk.mxu1 %vm3343_vm8, %v1568_v2  ;;  %2395 = vmatmul.mubr.msk.f32.vlgmr.msra.gmra.mxu0 %vm885_vm12, %v2378_v23  ;;  %v2574_v8 = vpop.permute.xlu1 %2573  ;;  %v1903_v25 = vpop.permute.xlu0 %1902 }
 0x226   : > { %2372 = vmatpush1.msk.msra.mxu1 %vm3353_vm9, %v1567_v47  ;;  %2400 = vmatpush1.msk.msra.mxu0 %vm3353_vm9, %v2086_v17  ;;  %v2575_v60 = vunpack.i.l.bf16 %v2574_v8  ;;  %v2576_v52 = vunpack.i.h.bf16 %v2574_v8  ;;  %v1927_v15 = vsel %vm1914_vm15, %v1903_v25, %v3763_v20 }
 0x227   : > { %2373 = vmatprep.subr.msk.mxu1 %vm3343_vm8, %v1566_v18  ;;  %2189 = vmatprep.mubr.f32.mxu0 %v4068_v10 }
 0x228   : > { %2374 = vmatpush1.msk.msra.mxu1 %vm3353_vm9, %v1565_v6 }
 0x229   : > { %2375 = vmatprep.subr.msk.mxu1 %vm3343_vm8, %v1564_v34  ;;  %v1897_v53 = vpop.permute.xlu1 %1896  ;;  %v1899_v9 = vpop.permute.xlu0 %1898 }
 0x22a   : > { %2376 = vmatpush1.msk.msra.mxu1 %vm3353_vm9, %v1563_v16  ;;  %v1926_v13 = vsel %vm1914_vm15, %v1899_v9, %v2575_v60  ;;  %v1925_v28 = vsel %vm1914_vm15, %v1897_v53, %v1899_v9 }
 0x22b   : > { %1966 = vmatprep.subr.mxu1 %v1930_v56  ;;  %2377 = vmatmul.mubr.msk.f32.vlgmr.msra.gmra.mxu1 %vm885_vm12, %v2360_v59 }
 0x22c   : > { %1967 = vmatpush1.msra.mxu1 %v1929_v14  ;;  %2014 = vmatprep.mubr.f32.mxu1 %v4068_v10 }
 0x22d   : > { %1968 = vmatprep.subr.mxu1 %v1928_v26  ;;  %v1893_v30 = vpop.permute.xlu1 %1892  ;;  %v2062_v50 = vpop.permute.xlu0 %2061 }
 0x22e   : > { %1969 = vmatpush1.msra.mxu1 %v1927_v15  ;;  %v2085_v0 = vsel %vm2071_vm14, %v2062_v50, %v2571_v37  ;;  %v1924_v33 = vsel %vm1914_vm15, %v1893_v30, %v2576_v52  ;;  %v2396_v15 = vld [vmem:[%s3982_s4 + $0x38] sm:$0xff] }
 0x22f   : > { %1970 = vmatprep.subr.mxu1 %v1926_v13  ;;  %2401 = vmatprep.subr.msk.mxu0 %vm3343_vm8, %v2085_v0  ;;  %v2398_v0 = vld [vmem:[%s3982_s4 + $0x40] sm:$0xff] }
 0x230   : > { %1971 = vmatpush1.msra.mxu1 %v1925_v28 }
 0x231   : > { %1972 = vmatprep.subr.mxu1 %v1924_v33  ;;  %v2579_v20 = vpop.permute.xlu1 %2578  ;;  %v2060_v42 = vpop.permute.xlu0 %2059 }
 0x232   : > { %v2580_v3 = vunpack.i.l.bf16 %v2579_v20  ;;  %v2084_v10 = vsel %vm2071_vm14, %v2060_v42, %v2062_v50  ;;  %v2581_v49 = vunpack.i.h.bf16 %v2579_v20 }
 0x233   : > { %2402 = vmatpush1.msk.msra.mxu0 %vm3353_vm9, %v2084_v10 }
 0x235   : > { %v2054_v41 = vpop.permute.xlu1 %2053  ;;  %v2056_v62 = vpop.permute.xlu0 %2055 }
 0x236   : > { %v2082_v54 = vsel %vm2071_vm14, %v2054_v41, %v2056_v62  ;;  %v2083_v39 = vsel %vm2071_vm14, %v2056_v62, %v2580_v3  ;;  %v4164_v62 = vld [vmem:[#allocation24_spill] sm:$0xff] }
 0x237   : > { %2403 = vmatprep.subr.msk.mxu0 %vm3343_vm8, %v2083_v39 }
 0x238   : > { %2404 = vmatpush1.msk.msra.mxu0 %vm3353_vm9, %v2082_v54  ;;  %v303_v54 = vmul.f32 0.00390625, %v4164_v62 }
 0x239   : > { %v2584_v19 = vpop.permute.xlu1 %2583  ;;  %v1891_v46 = vpop.permute.xlu0 %1890 }
 0x23a   : > { %v2585_v35 = vunpack.i.l.bf16 %v2584_v19  ;;  %v1923_v57 = vsel %vm1914_vm15, %v1891_v46, %v1893_v30  ;;  %v2586_v55 = vunpack.i.h.bf16 %v2584_v19 }
 0x23b   : > { %1973 = vmatpush1.msra.mxu1 %v1923_v57  ;;  %v304_v57 = vadd.f32 1e-05, %v303_v54 }
 0x23d   : > { %v1885_v58 = vpop.permute.xlu1 %1884  ;;  %v1887_v12 = vpop.permute.xlu0 %1886  ;;  %2603 = vrsqrt.f32 %v304_v57 }
 0x23e   : > { %v1921_v43 = vsel %vm1914_vm15, %v1885_v58, %v1887_v12  ;;  %v1922_v29 = vsel %vm1914_vm15, %v1887_v12, %v2585_v35 }
 0x23f   : > { %1974 = vmatprep.subr.mxu1 %v1922_v29 }
 0x240   : > { %1975 = vmatpush1.msra.mxu1 %v1921_v43 }
 0x241   : > { %v1881_v63 = vpop.permute.xlu1 %1880  ;;  %v2050_v4 = vpop.permute.xlu0 %2049 }
 0x242   : > { %v2081_v61 = vsel %vm2071_vm14, %v2050_v4, %v2581_v49  ;;  %v1920_v48 = vsel %vm1914_vm15, %v1881_v63, %v2586_v55 }
 0x243   : > { %1976 = vmatprep.subr.mxu1 %v1920_v48  ;;  %2405 = vmatprep.subr.msk.mxu0 %vm3343_vm8, %v2081_v61 }
 0x245   : > { %v2589_v40 = vpop.permute.xlu1 %2588  ;;  %v2048_v51 = vpop.permute.xlu0 %2047 }
 0x246   : > { %v2590_v38 = vunpack.i.l.bf16 %v2589_v40  ;;  %v2080_v22 = vsel %vm2071_vm14, %v2048_v51, %v2050_v4  ;;  %v2591_v25 = vunpack.i.h.bf16 %v2589_v40 }
 0x247   : > { %2406 = vmatpush1.msk.msra.mxu0 %vm3353_vm9, %v2080_v22 }
 0x249   : > { %v2042_v27 = vpop.permute.xlu1 %2041  ;;  %v2044_v1 = vpop.permute.xlu0 %2043 }
 0x24a   : > { %v2078_v32 = vsel %vm2071_vm14, %v2042_v27, %v2044_v1  ;;  %v2079_v31 = vsel %vm2071_vm14, %v2044_v1, %v2590_v38 }
 0x24b   : > { %2407 = vmatprep.subr.msk.mxu0 %vm3343_vm8, %v2079_v31  ;;  %v2604_v31 = vpop.eup %2603 }
 0x24c   : > { %2408 = vmatpush1.msk.msra.mxu0 %vm3353_vm9, %v2078_v32 }
 0x24d   : > { %v2594_v11 = vpop.permute.xlu1 %2593  ;;  %v1879_v23 = vpop.permute.xlu0 %1878 }
 0x24e   : > { %v2595_v44 = vunpack.i.l.bf16 %v2594_v11  ;;  %v1919_v5 = vsel %vm1914_vm15, %v1879_v23, %v1881_v63  ;;  %v2596_v21 = vunpack.i.h.bf16 %v2594_v11 }
 0x24f   : > { %1977 = vmatpush1.msra.mxu1 %v1919_v5 }
 0x251   : > { %v1873_v17 = vpop.permute.xlu1 %1872  ;;  %v1875_v2 = vpop.permute.xlu0 %1874 }
 0x252   : > { %v1917_v47 = vsel %vm1914_vm15, %v1873_v17, %v1875_v2  ;;  %v1918_v8 = vsel %vm1914_vm15, %v1875_v2, %v2595_v44  ;;  %v4165_v17 = vld [vmem:[#allocation3_spill] sm:$0xff] }
 0x253   : > { %1978 = vmatprep.subr.mxu1 %v1918_v8  ;;  %v313_v2 = vrot.slane %v2604_v31, %v4165_v17 }
 0x254   : > { %1979 = vmatpush1.msra.mxu1 %v1917_v47 }
 0x255   : > { %v1869_v18 = vpop.permute.xlu1 %1868  ;;  %v2038_v7 = vpop.permute.xlu0 %2037 }
 0x256   : > { %v2077_v6 = vsel %vm2071_vm14, %v2038_v7, %v2591_v25  ;;  %v1916_v34 = vsel %vm1914_vm15, %v1869_v18, %v2596_v21 }
 0x257   : > { %1980 = vmatprep.subr.mxu1 %v1916_v34  ;;  %2409 = vmatprep.subr.msk.mxu0 %vm3343_vm8, %v2077_v6 }
 0x259   : > { %v2599_v36 = vpop.permute.xlu1 %2598 }
 0x25a   : > { %v2036_v59 = vpop.permute.xlu0 %2035  ;;  %v2600_v60 = vunpack.i.l.bf16 %v2599_v36  ;;  %v2601_v26 = vunpack.i.h.bf16 %v2599_v36 }
 0x25b   : > { %v2076_v16 = vsel %vm2071_vm14, %v2036_v59, %v2038_v7 }
 0x25c   : > { %2410 = vmatpush1.msk.msra.mxu0 %vm3353_vm9, %v2076_v16 }
 0x25d   : > { %v2030_v53 = vpop.permute.xlu1 %2029 }
 0x25e   : > { %v2032_v9 = vpop.permute.xlu0 %2031 }
 0x25f   : > { %v2074_v56 = vsel %vm2071_vm14, %v2030_v53, %v2032_v9  ;;  %v2075_v52 = vsel %vm2071_vm14, %v2032_v9, %v2600_v60 }
 0x260   : > { %2411 = vmatprep.subr.msk.mxu0 %vm3343_vm8, %v2075_v52 }
 0x261   : > { %2412 = vmatpush1.msk.msra.mxu0 %vm3353_vm9, %v2074_v56 }
 0x262   : > { %v2024_v13 = vpop.permute.xlu1 %2023 }
 0x263   : > { %v1867_v14 = vpop.permute.xlu0 %1866 }
 0x264   : > { %v1915_v37 = vsel %vm1914_vm15, %v1867_v14, %v1869_v18  ;;  %v4166_v18 = vld [vmem:[#allocation4_spill] sm:$0xff] }
 0x265   : > { %1981 = vmatpush1.msra.mxu1 %v1915_v37  ;;  %v315_v7 = vmul.f32 %v313_v2, %v4166_v18 }
 0x266   : > { %2397 = vmatmul.mubr.msk.f32.vlgmr.msra.gmra.mxu1 %vm885_vm12, %v2396_v15 }
 0x267   : > { %v2026_v28 = vpop.permute.xlu0 %2025 }
 0x268   : > { %v2072_v30 = vsel %vm2071_vm14, %v2024_v13, %v2026_v28  ;;  %v2073_v50 = vsel %vm2071_vm14, %v2026_v28, %v2601_v26 }
 0x269   : > { %2413 = vmatprep.subr.msk.mxu0 %vm3343_vm8, %v2073_v50 }
 0x26a   : > { %2414 = vmatpush1.msk.msra.mxu0 %vm3353_vm9, %v2072_v30 }
 0x26b   : > { %2415 = vmatmul.mubr.msk.f32.vlgmr.msra.gmra.mxu0 %vm885_vm12, %v2398_v0 }
 0x275   : > { %v2202_v47 = vpop.permute.xlu0 %2201 }
 0x2b7   : > { %v955_v33 = vpop.f32.mrf.mxu1 }
 0x2b9   : > { %v957_v20 = vpop.f32.mrf.mxu1 }
 0x2c0   : > { %v1206_v10 = vpop.f32.mrf.mxu0 }
 0x2c2   : > { %v1208_v19 = vpop.f32.mrf.mxu0 }
 0x2c9   : > { %v1029_v42 = vpop.f32.mrf.mxu1 }
 0x2ca   : > { %v1030_v41 = vadd.f32 %v1029_v42, %v955_v33 }
 0x2cb   : > { %v1031_v3 = vpop.f32.mrf.mxu1 }
 0x2cc   : > { %v1032_v39 = vadd.f32 %v1031_v3, %v957_v20  ;;  %v1211_v35 = vadd.f32 %v1206_v10, %v1030_v41 }
 0x2ce   : > { %v1212_v24 = vadd.f32 %v1208_v19, %v1032_v39 }
 0x2d2   : > { %v1459_v12 = vpop.f32.mrf.mxu0 }
 0x2d4   : > { %v1461_v43 = vpop.f32.mrf.mxu0 }
 0x2db   : > { %v1381_v46 = vpop.f32.mrf.mxu1 }
 0x2dc   : > { %v1386_v45 = vadd.f32 %v1381_v46, %v1211_v35 }
 0x2dd   : > { %v1383_v58 = vpop.f32.mrf.mxu1 }
 0x2de   : > { %v1387_v55 = vadd.f32 %v1383_v58, %v1212_v24  ;;  %v1464_v49 = vadd.f32 %v1459_v12, %v1386_v45 }
 0x2e0   : > { %v1465_v63 = vadd.f32 %v1461_v43, %v1387_v55 }
 0x2e5   : > { %v1857_v61 = vpop.f32.mrf.mxu0 }
 0x2e7   : > { %v1859_v38 = vpop.f32.mrf.mxu0 }
 0x2eb   : > { %v1682_v29 = vpop.f32.mrf.mxu1 }
 0x2ec   : > { %v1687_v48 = vadd.f32 %v1682_v29, %v1464_v49 }
 0x2ed   : > { %v1684_v4 = vpop.f32.mrf.mxu1 }
 0x2ee   : > { %v1688_v40 = vadd.f32 %v1684_v4, %v1465_v63  ;;  %v1862_v22 = vadd.f32 %v1857_v61, %v1687_v48 }
 0x2f0   : > { %v1863_v1 = vadd.f32 %v1859_v38, %v1688_v40 }
 0x326   : > { %v2016_v51 = vpop.f32.mrf.mxu1 }
 0x327   : > { %v2021_v32 = vadd.f32 %v2016_v51, %v1862_v22 }
 0x328   : > { %v2018_v27 = vpop.f32.mrf.mxu1 }
 0x329   : > { %v2022_v23 = vadd.f32 %v2018_v27, %v1863_v1 }
 0x32b   : > { %v2191_v11 = vpop.f32.mrf.mxu0 }
 0x32c   : > { %v2196_v44 = vadd.f32 %v2191_v11, %v2021_v32 }
 0x32d   : > { %v2193_v5 = vpop.f32.mrf.mxu0 }
 0x32e   : > { %v2197_v21 = vadd.f32 %v2193_v5, %v2022_v23  ;;  %v2204_v8 = vadd.f32 %v2202_v47, %v2196_v44 }
 0x330   : > { %v2205_v25 = vadd.f32 %v2202_v47, %v2197_v21 }
 0x332   : > { %v2208_v6 = vcombine.low %v2204_v8, %v2205_v25  ;;  %v2211_v36 = vcombine.high %v2204_v8, %v2205_v25 }
 0x334   : > { %v2210_v34 = vmul.f32 %v2208_v6, %v315_v7 }
 0x336   : > { %v2213_v59 = vadd.f32 %v2211_v36, %v2210_v34 }
 0x338   : > { %2214 = vst [vmem:[%s271_s30] sm:$0xff] %v2213_v59 }
 0x339 PF: > { %s16_s21 = sadd.s32 1, %s2611_s21  }
 0x33a   : > { %p13_p4 = scmp.ge.s32.totalorder %s16_s21, 4  }
 0x33c   :  { %15 = sbr.rel (!%p13_p4) target bundleno = 1 (0x1), region = 85 }

</bundles_post_ra>
